<compile_context>
chip_gen: v5e
topology: v5e:2x2
jax: 0.10.0
libtpu: 0.0.40
codegen_flags: <defaults>
</compile_context>

<pallas_src>
import jax
import jax.numpy as jnp
from jax import lax
from jax.experimental import pallas as pl
from jax.experimental.pallas import tpu as pltpu


def bilstm_risk_kernel(x_ref, wih_ref, whh_ref, b_ref, whead_ref, bhead_ref,
                       out_ref):
    B, T, D = x_ref.shape
    H2 = whh_ref.shape[0]            # 2H (state width, lanes = [fwd | bwd])
    H = H2 // 2
    G8 = wih_ref.shape[1]            # 8H (fused gate width, both directions)
    mxu_dtype = whh_ref.dtype

    # ---- Hoisted input projection: one MXU matmul for the whole sequence ----
    # x is consumed in its natural (B, T, D) layout; merging the leading dims
    # is a sublane-only reshape (no transpose, no extra HBM traffic).
    x2d = x_ref[...].reshape(B * T, D)
    xp = (jnp.dot(x2d, wih_ref[...], preferred_element_type=jnp.float32)
          + b_ref[...]).reshape(B, T, G8)                       # f32 (B,T,8H)

    whh = whh_ref[...]               # (2H, 8H) block-diagonal, vreg-resident

    # Lane mask: within each per-gate 2H group, the first H lanes are fwd.
    lane = lax.broadcasted_iota(jnp.int32, (B, G8), 1)
    is_fwd = (lane % H2) < H

    # Pre-combined per-step gate inputs: fwd lanes take time t, bwd lanes take
    # time T-1-t.  Built once, off the recurrence's critical path.
    xp_steps = [jnp.where(is_fwd, xp[:, t, :], xp[:, T - 1 - t, :])
                for t in range(T)]

    # ---- Fused fwd/bwd recurrence on a single (B, 2H) state slab ----
    # TODO(synk): for production-size T switch to a partially-unrolled
    # fori_loop / time grid with a double-buffered VMEM Xproj scratch.
    h = jnp.zeros((B, H2), jnp.float32)
    c = jnp.zeros((B, H2), jnp.float32)
    hsum = jnp.zeros((B, H2), jnp.float32)
    for t in range(T):
        rec = jnp.dot(h.astype(mxu_dtype), whh,
                      preferred_element_type=jnp.float32)       # (B, 8H)
        pre = xp_steps[t] + rec
        # Gate slices are contiguous 2H-lane blocks ([fwd | bwd] per gate).
        i = jax.nn.sigmoid(pre[:, 0 * H2:1 * H2])
        f = jax.nn.sigmoid(pre[:, 1 * H2:2 * H2])
        g = jnp.tanh(pre[:, 2 * H2:3 * H2])
        o = jax.nn.sigmoid(pre[:, 3 * H2:4 * H2])
        c = f * c + i * g
        h = o * jnp.tanh(c)
        hsum = hsum + h

    # ---- Mean over time (already [mean_fwd | mean_bwd]) + fused heads ----
    feat = hsum * jnp.float32(1.0 / T)                          # (B, 2H)
    out_ref[...] = (jnp.dot(feat, whead_ref[...],
                            preferred_element_type=jnp.float32)
                    + bhead_ref[...])                           # (B, C+1)


def bilstm_with_risk(x, lengths, params, *, mxu_dtype=jnp.float32):
    """x: (B, T, D) batch-first like PyTorch; lengths unused (matches torch).

    mxu_dtype: dtype of the MXU operands (x / W_ih / W_hh).  Use bfloat16 on
    v6e/v7x for throughput; accumulation, gate math and state stay float32.
    """
    del lengths
    B, T, D = x.shape
    Cp1 = params["whead"].shape[1]

    args = (x.astype(mxu_dtype),
            params["wih"].astype(mxu_dtype),
            params["whh"].astype(mxu_dtype),
            params["b"].astype(jnp.float32),
            params["whead"].astype(jnp.float32),
            params["bhead"].astype(jnp.float32))

    vmem = pl.BlockSpec(memory_space=pltpu.MemorySpace.VMEM)
    out = pl.pallas_call(
        bilstm_risk_kernel,
        out_shape=jax.ShapeDtypeStruct((B, Cp1), jnp.float32),
        in_specs=[vmem] * len(args),
        out_specs=vmem,
        compiler_params=pltpu.CompilerParams(
            # Explicit scoped-VMEM budget (the 16 MiB v5e / 32 MiB v6e+v7x
            # scoped defaults are the binding limit, not physical VMEM).
            vmem_limit_bytes=32 * 1024 * 1024),
    )(*args)
    return out[:, :Cp1 - 1], out[:, Cp1 - 1]


def init_params(key, input_dim, hidden_dim, num_classes):
    """Deterministic init mirroring PyTorch parameter shapes, re-laid-out for
    the kernel: per-gate [fwd | bwd] lane pairs, biases pre-summed (b_ih+b_hh),
    block-diagonal recurrent weight, heads fused into one (2H, C+1) matrix."""
    D, H, C = input_dim, hidden_dim, num_classes
    G = 4 * H
    k_lstm = 1.0 / jnp.sqrt(jnp.float32(H))
    keys = jax.random.split(key, 12)

    def u(k, shape, scale):
        return jax.random.uniform(k, shape, jnp.float32, -scale, scale)

    def lstm_dir(k_ih, k_hh, k_bih, k_bhh):
        w_ih = u(k_ih, (G, D), k_lstm)   # torch weight_ih_l0: (4H, D), gates i,f,g,o
        w_hh = u(k_hh, (G, H), k_lstm)   # torch weight_hh_l0: (4H, H)
        b = u(k_bih, (G,), k_lstm) + u(k_bhh, (G,), k_lstm)
        return w_ih.T, w_hh.T, b         # (D, 4H), (H, 4H), (4H,)

    wih_f, whh_f, b_f = lstm_dir(keys[0], keys[1], keys[2], keys[3])
    wih_b, whh_b, b_b = lstm_dir(keys[4], keys[5], keys[6], keys[7])

    def interleave(a_f, a_b):
        # (..., 4H) per direction with gate blocks [i|f|g|o] ->
        # (..., 8H) with per-gate [fwd H | bwd H] pairs: [i_f i_b f_f f_b ...]
        af = a_f.reshape(a_f.shape[:-1] + (4, H))
        ab = a_b.reshape(a_b.shape[:-1] + (4, H))
        return jnp.concatenate([af, ab], axis=-1).reshape(
            a_f.shape[:-1] + (8 * H,))

    zeros_h = jnp.zeros((H, G), jnp.float32)
    # Block-diagonal recurrent weight: rows [:H] = h_fwd -> fwd gate columns,
    # rows [H:] = h_bwd -> bwd gate columns.
    whh = interleave(jnp.concatenate([whh_f, zeros_h], axis=0),
                     jnp.concatenate([zeros_h, whh_b], axis=0))   # (2H, 8H)

    k_lin = 1.0 / jnp.sqrt(jnp.float32(2 * H))
    w_cls = u(keys[8], (C, 2 * H), k_lin)    # torch Linear(2H, C).weight
    b_cls = u(keys[9], (C,), k_lin)
    w_risk = u(keys[10], (1, 2 * H), k_lin)  # torch Linear(2H, 1).weight
    b_risk = u(keys[11], (1,), k_lin)

    return dict(
        wih=interleave(wih_f, wih_b),                         # (D, 8H)
        whh=whh,                                              # (2H, 8H)
        b=interleave(b_f, b_b).reshape(1, 8 * H),             # (1, 8H)
        whead=jnp.concatenate([w_cls, w_risk], axis=0).T,     # (2H, C+1)
        bhead=jnp.concatenate([b_cls, b_risk]).reshape(1, C + 1),
    )


def reference_forward(x, params):
    """Pure-JAX reference of the same math (standard per-direction LSTMs) for
    a sanity check; de-interleaves the kernel's packed parameter layout."""
    B, T, D = x.shape
    H2 = params["whh"].shape[0]
    H = H2 // 2
    C = params["whead"].shape[1] - 1

    def deinterleave(a):
        a4 = a.reshape(a.shape[:-1] + (4, H2))
        return (a4[..., :H].reshape(a.shape[:-1] + (4 * H,)),
                a4[..., H:].reshape(a.shape[:-1] + (4 * H,)))

    wih_f, wih_b = deinterleave(params["wih"])        # (D, 4H) each
    whh_fc, whh_bc = deinterleave(params["whh"])      # (2H, 4H) each
    whh_f, whh_b = whh_fc[:H], whh_bc[H:]             # drop zero blocks
    b_f, b_b = deinterleave(params["b"])              # (1, 4H) each

    x_tm = jnp.transpose(x, (1, 0, 2)).astype(jnp.float32)
    zeros = jnp.zeros((B, H), jnp.float32)

    def run_dir(xs, wih, whh, b):
        def step(carry, x_t):
            h, c = carry
            pre = x_t @ wih + h @ whh + b
            i = jax.nn.sigmoid(pre[:, :H])
            f = jax.nn.sigmoid(pre[:, H:2 * H])
            g = jnp.tanh(pre[:, 2 * H:3 * H])
            o = jax.nn.sigmoid(pre[:, 3 * H:])
            c = f * c + i * g
            h = o * jnp.tanh(c)
            return (h, c), h
        _, hs = lax.scan(step, (zeros, zeros), xs)
        return hs  # (T, B, H)

    hs_f = run_dir(x_tm, wih_f, whh_f, b_f)
    hs_b = run_dir(x_tm[::-1], wih_b, whh_b, b_b)
    feat = jnp.concatenate([hs_f.mean(axis=0), hs_b.mean(axis=0)], axis=1)
    out = feat @ params["whead"] + params["bhead"]
    return out[:, :C], out[:, C]


if __name__ == "__main__":
    B, T, D, H, C = 2, 8, 64, 32, 3  # small shapes consistent with the module

    key = jax.random.PRNGKey(0)
    k_x, k_p = jax.random.split(key)
    x = jax.random.normal(k_x, (B, T, D), jnp.float32)
    lengths = jnp.full((B,), T, jnp.int32)
    params = init_params(k_p, D, H, C)

    logits, risk = jax.block_until_ready(bilstm_with_risk(x, lengths, params))

    ref_logits, ref_risk = reference_forward(x, params)
    assert logits.shape == (B, C) and risk.shape == (B,)
    assert jnp.allclose(logits, ref_logits, rtol=1e-4, atol=1e-5)
    assert jnp.allclose(risk, ref_risk, rtol=1e-4, atol=1e-5)

    print("KERNEL_OK")
</pallas_src>

<mosaic_0001>
module attributes {stable_mosaic.version = 11 : i64} {
  func.func @bilstm_risk_kernel(%arg0: memref<2x8x64xf32, #tpu.memory_space<vmem>>, %arg1: memref<64x256xf32, #tpu.memory_space<vmem>>, %arg2: memref<64x256xf32, #tpu.memory_space<vmem>>, %arg3: memref<1x256xf32, #tpu.memory_space<vmem>>, %arg4: memref<64x4xf32, #tpu.memory_space<vmem>>, %arg5: memref<1x4xf32, #tpu.memory_space<vmem>>, %arg6: memref<2x4xf32, #tpu.memory_space<vmem>>) attributes {dimension_semantics = [], scalar_prefetch = 0 : i64, scratch_operands = 0 : i64, tpu.core_type = #tpu.core_type<tc>} {
    %c0 = arith.constant 0 : index
    %c0_0 = arith.constant 0 : index
    %c0_1 = arith.constant 0 : index
    %0 = vector.load %arg0[%c0, %c0_0, %c0_1] : memref<2x8x64xf32, #tpu.memory_space<vmem>>, vector<2x8x64xf32>
    %1 = vector.shape_cast %0 : vector<2x8x64xf32> to vector<16x64xf32>
    %c0_2 = arith.constant 0 : index
    %c0_3 = arith.constant 0 : index
    %2 = vector.load %arg1[%c0_2, %c0_3] : memref<64x256xf32, #tpu.memory_space<vmem>>, vector<64x256xf32>
    %cst = arith.constant dense<0.000000e+00> : vector<16x256xf32>
    %3 = tpu.matmul %1, %2, %cst {dimension_numbers = #tpu.dot_dimension_numbers<[1], [0], [0], [1], [0, 0, 1, 1], [], []>} : vector<16x64xf32>, vector<64x256xf32>, vector<16x256xf32> -> vector<16x256xf32>
    %c0_4 = arith.constant 0 : index
    %c0_5 = arith.constant 0 : index
    %4 = vector.load %arg3[%c0_4, %c0_5] : memref<1x256xf32, #tpu.memory_space<vmem>>, vector<1x256xf32>
    %5 = vector.broadcast %4 : vector<1x256xf32> to vector<16x256xf32>
    %6 = arith.addf %3, %5 : vector<16x256xf32>
    %7 = vector.shape_cast %6 : vector<16x256xf32> to vector<2x8x256xf32>
    %c0_6 = arith.constant 0 : index
    %c0_7 = arith.constant 0 : index
    %8 = vector.load %arg2[%c0_6, %c0_7] : memref<64x256xf32, #tpu.memory_space<vmem>>, vector<64x256xf32>
    %9 = tpu.iota {dimensions = array<i32: 1>} : vector<2x256xi32>
    %c64_i32 = arith.constant 64 : i32
    %c0_i32 = arith.constant 0 : i32
    %10 = arith.cmpi eq, %c64_i32, %c0_i32 : i32
    %c1_i32 = arith.constant 1 : i32
    %11 = arith.select %10, %c1_i32, %c64_i32 : i32
    %12 = vector.broadcast %11 : i32 to vector<2x256xi32>
    %13 = arith.remsi %9, %12 : vector<2x256xi32>
    %c0_i32_8 = arith.constant 0 : i32
    %14 = vector.broadcast %c0_i32_8 : i32 to vector<2x256xi32>
    %15 = arith.cmpi ne, %13, %14 : vector<2x256xi32>
    %c0_i32_9 = arith.constant 0 : i32
    %16 = vector.broadcast %c0_i32_9 : i32 to vector<2x256xi32>
    %17 = arith.cmpi slt, %13, %16 : vector<2x256xi32>
    %c0_i32_10 = arith.constant 0 : i32
    %18 = arith.cmpi slt, %11, %c0_i32_10 : i32
    %19 = vector.broadcast %18 : i1 to vector<2x256xi1>
    %20 = vector.broadcast %19 : vector<2x256xi1> to vector<2x256xi1>
    %21 = arith.xori %17, %20 : vector<2x256xi1>
    %22 = arith.andi %21, %15 : vector<2x256xi1>
    %23 = vector.broadcast %11 : i32 to vector<2x256xi32>
    %24 = arith.addi %13, %23 : vector<2x256xi32>
    %25 = arith.select %22, %24, %13 : vector<2x256xi1>, vector<2x256xi32>
    %c32_i32 = arith.constant 32 : i32
    %26 = vector.broadcast %c32_i32 : i32 to vector<2x256xi32>
    %27 = arith.cmpi slt, %25, %26 : vector<2x256xi32>
    %28 = vector.extract_strided_slice %7 {offsets = [0, 0, 0], sizes = [2, 1, 256], strides = [1, 1, 1]} : vector<2x8x256xf32> to vector<2x1x256xf32>
    %29 = vector.shape_cast %28 : vector<2x1x256xf32> to vector<2x256xf32>
    %30 = vector.extract_strided_slice %7 {offsets = [0, 7, 0], sizes = [2, 1, 256], strides = [1, 1, 1]} : vector<2x8x256xf32> to vector<2x1x256xf32>
    %31 = vector.shape_cast %30 : vector<2x1x256xf32> to vector<2x256xf32>
    %32 = arith.select %27, %29, %31 : vector<2x256xi1>, vector<2x256xf32>
    %33 = vector.extract_strided_slice %7 {offsets = [0, 1, 0], sizes = [2, 1, 256], strides = [1, 1, 1]} : vector<2x8x256xf32> to vector<2x1x256xf32>
    %34 = vector.shape_cast %33 : vector<2x1x256xf32> to vector<2x256xf32>
    %35 = vector.extract_strided_slice %7 {offsets = [0, 6, 0], sizes = [2, 1, 256], strides = [1, 1, 1]} : vector<2x8x256xf32> to vector<2x1x256xf32>
    %36 = vector.shape_cast %35 : vector<2x1x256xf32> to vector<2x256xf32>
    %37 = arith.select %27, %34, %36 : vector<2x256xi1>, vector<2x256xf32>
    %38 = vector.extract_strided_slice %7 {offsets = [0, 2, 0], sizes = [2, 1, 256], strides = [1, 1, 1]} : vector<2x8x256xf32> to vector<2x1x256xf32>
    %39 = vector.shape_cast %38 : vector<2x1x256xf32> to vector<2x256xf32>
    %40 = vector.extract_strided_slice %7 {offsets = [0, 5, 0], sizes = [2, 1, 256], strides = [1, 1, 1]} : vector<2x8x256xf32> to vector<2x1x256xf32>
    %41 = vector.shape_cast %40 : vector<2x1x256xf32> to vector<2x256xf32>
    %42 = arith.select %27, %39, %41 : vector<2x256xi1>, vector<2x256xf32>
    %43 = vector.extract_strided_slice %7 {offsets = [0, 3, 0], sizes = [2, 1, 256], strides = [1, 1, 1]} : vector<2x8x256xf32> to vector<2x1x256xf32>
    %44 = vector.shape_cast %43 : vector<2x1x256xf32> to vector<2x256xf32>
    %45 = vector.extract_strided_slice %7 {offsets = [0, 4, 0], sizes = [2, 1, 256], strides = [1, 1, 1]} : vector<2x8x256xf32> to vector<2x1x256xf32>
    %46 = vector.shape_cast %45 : vector<2x1x256xf32> to vector<2x256xf32>
    %47 = arith.select %27, %44, %46 : vector<2x256xi1>, vector<2x256xf32>
    %48 = vector.extract_strided_slice %7 {offsets = [0, 4, 0], sizes = [2, 1, 256], strides = [1, 1, 1]} : vector<2x8x256xf32> to vector<2x1x256xf32>
    %49 = vector.shape_cast %48 : vector<2x1x256xf32> to vector<2x256xf32>
    %50 = vector.extract_strided_slice %7 {offsets = [0, 3, 0], sizes = [2, 1, 256], strides = [1, 1, 1]} : vector<2x8x256xf32> to vector<2x1x256xf32>
    %51 = vector.shape_cast %50 : vector<2x1x256xf32> to vector<2x256xf32>
    %52 = arith.select %27, %49, %51 : vector<2x256xi1>, vector<2x256xf32>
    %53 = vector.extract_strided_slice %7 {offsets = [0, 5, 0], sizes = [2, 1, 256], strides = [1, 1, 1]} : vector<2x8x256xf32> to vector<2x1x256xf32>
    %54 = vector.shape_cast %53 : vector<2x1x256xf32> to vector<2x256xf32>
    %55 = vector.extract_strided_slice %7 {offsets = [0, 2, 0], sizes = [2, 1, 256], strides = [1, 1, 1]} : vector<2x8x256xf32> to vector<2x1x256xf32>
    %56 = vector.shape_cast %55 : vector<2x1x256xf32> to vector<2x256xf32>
    %57 = arith.select %27, %54, %56 : vector<2x256xi1>, vector<2x256xf32>
    %58 = vector.extract_strided_slice %7 {offsets = [0, 6, 0], sizes = [2, 1, 256], strides = [1, 1, 1]} : vector<2x8x256xf32> to vector<2x1x256xf32>
    %59 = vector.shape_cast %58 : vector<2x1x256xf32> to vector<2x256xf32>
    %60 = vector.extract_strided_slice %7 {offsets = [0, 1, 0], sizes = [2, 1, 256], strides = [1, 1, 1]} : vector<2x8x256xf32> to vector<2x1x256xf32>
    %61 = vector.shape_cast %60 : vector<2x1x256xf32> to vector<2x256xf32>
    %62 = arith.select %27, %59, %61 : vector<2x256xi1>, vector<2x256xf32>
    %63 = vector.extract_strided_slice %7 {offsets = [0, 7, 0], sizes = [2, 1, 256], strides = [1, 1, 1]} : vector<2x8x256xf32> to vector<2x1x256xf32>
    %64 = vector.shape_cast %63 : vector<2x1x256xf32> to vector<2x256xf32>
    %65 = vector.extract_strided_slice %7 {offsets = [0, 0, 0], sizes = [2, 1, 256], strides = [1, 1, 1]} : vector<2x8x256xf32> to vector<2x1x256xf32>
    %66 = vector.shape_cast %65 : vector<2x1x256xf32> to vector<2x256xf32>
    %67 = arith.select %27, %64, %66 : vector<2x256xi1>, vector<2x256xf32>
    %cst_11 = arith.constant 0.000000e+00 : f32
    %68 = vector.broadcast %cst_11 : f32 to vector<2x64xf32>
    %cst_12 = arith.constant 0.000000e+00 : f32
    %69 = vector.broadcast %cst_12 : f32 to vector<2x64xf32>
    %cst_13 = arith.constant 0.000000e+00 : f32
    %70 = vector.broadcast %cst_13 : f32 to vector<2x64xf32>
    %cst_14 = arith.constant dense<0.000000e+00> : vector<2x256xf32>
    %71 = tpu.matmul %68, %8, %cst_14 {dimension_numbers = #tpu.dot_dimension_numbers<[1], [0], [0], [1], [0, 0, 1, 1], [], []>} : vector<2x64xf32>, vector<64x256xf32>, vector<2x256xf32> -> vector<2x256xf32>
    %72 = arith.addf %32, %71 : vector<2x256xf32>
    %73 = vector.extract_strided_slice %72 {offsets = [0, 0], sizes = [2, 64], strides = [1, 1]} : vector<2x256xf32> to vector<2x64xf32>
    %74 = arith.negf %73 : vector<2x64xf32>
    %75 = math.exp %74 : vector<2x64xf32>
    %cst_15 = arith.constant 1.000000e+00 : f32
    %76 = vector.broadcast %cst_15 : f32 to vector<2x64xf32>
    %77 = arith.addf %76, %75 : vector<2x64xf32>
    %78 = arith.divf %76, %77 : vector<2x64xf32>
    %79 = vector.extract_strided_slice %72 {offsets = [0, 64], sizes = [2, 64], strides = [1, 1]} : vector<2x256xf32> to vector<2x64xf32>
    %80 = arith.negf %79 : vector<2x64xf32>
    %81 = math.exp %80 : vector<2x64xf32>
    %cst_16 = arith.constant 1.000000e+00 : f32
    %82 = vector.broadcast %cst_16 : f32 to vector<2x64xf32>
    %83 = arith.addf %82, %81 : vector<2x64xf32>
    %84 = arith.divf %82, %83 : vector<2x64xf32>
    %85 = vector.extract_strided_slice %72 {offsets = [0, 128], sizes = [2, 64], strides = [1, 1]} : vector<2x256xf32> to vector<2x64xf32>
    %86 = math.tanh %85 : vector<2x64xf32>
    %87 = vector.extract_strided_slice %72 {offsets = [0, 192], sizes = [2, 64], strides = [1, 1]} : vector<2x256xf32> to vector<2x64xf32>
    %88 = arith.negf %87 : vector<2x64xf32>
    %89 = math.exp %88 : vector<2x64xf32>
    %cst_17 = arith.constant 1.000000e+00 : f32
    %90 = vector.broadcast %cst_17 : f32 to vector<2x64xf32>
    %91 = arith.addf %90, %89 : vector<2x64xf32>
    %92 = arith.divf %90, %91 : vector<2x64xf32>
    %93 = arith.mulf %84, %69 : vector<2x64xf32>
    %94 = arith.mulf %78, %86 : vector<2x64xf32>
    %95 = arith.addf %93, %94 : vector<2x64xf32>
    %96 = math.tanh %95 : vector<2x64xf32>
    %97 = arith.mulf %92, %96 : vector<2x64xf32>
    %98 = arith.addf %70, %97 : vector<2x64xf32>
    %cst_18 = arith.constant dense<0.000000e+00> : vector<2x256xf32>
    %99 = tpu.matmul %97, %8, %cst_18 {dimension_numbers = #tpu.dot_dimension_numbers<[1], [0], [0], [1], [0, 0, 1, 1], [], []>} : vector<2x64xf32>, vector<64x256xf32>, vector<2x256xf32> -> vector<2x256xf32>
    %100 = arith.addf %37, %99 : vector<2x256xf32>
    %101 = vector.extract_strided_slice %100 {offsets = [0, 0], sizes = [2, 64], strides = [1, 1]} : vector<2x256xf32> to vector<2x64xf32>
    %102 = arith.negf %101 : vector<2x64xf32>
    %103 = math.exp %102 : vector<2x64xf32>
    %cst_19 = arith.constant 1.000000e+00 : f32
    %104 = vector.broadcast %cst_19 : f32 to vector<2x64xf32>
    %105 = arith.addf %104, %103 : vector<2x64xf32>
    %106 = arith.divf %104, %105 : vector<2x64xf32>
    %107 = vector.extract_strided_slice %100 {offsets = [0, 64], sizes = [2, 64], strides = [1, 1]} : vector<2x256xf32> to vector<2x64xf32>
    %108 = arith.negf %107 : vector<2x64xf32>
    %109 = math.exp %108 : vector<2x64xf32>
    %cst_20 = arith.constant 1.000000e+00 : f32
    %110 = vector.broadcast %cst_20 : f32 to vector<2x64xf32>
    %111 = arith.addf %110, %109 : vector<2x64xf32>
    %112 = arith.divf %110, %111 : vector<2x64xf32>
    %113 = vector.extract_strided_slice %100 {offsets = [0, 128], sizes = [2, 64], strides = [1, 1]} : vector<2x256xf32> to vector<2x64xf32>
    %114 = math.tanh %113 : vector<2x64xf32>
    %115 = vector.extract_strided_slice %100 {offsets = [0, 192], sizes = [2, 64], strides = [1, 1]} : vector<2x256xf32> to vector<2x64xf32>
    %116 = arith.negf %115 : vector<2x64xf32>
    %117 = math.exp %116 : vector<2x64xf32>
    %cst_21 = arith.constant 1.000000e+00 : f32
    %118 = vector.broadcast %cst_21 : f32 to vector<2x64xf32>
    %119 = arith.addf %118, %117 : vector<2x64xf32>
    %120 = arith.divf %118, %119 : vector<2x64xf32>
    %121 = arith.mulf %112, %95 : vector<2x64xf32>
    %122 = arith.mulf %106, %114 : vector<2x64xf32>
    %123 = arith.addf %121, %122 : vector<2x64xf32>
    %124 = math.tanh %123 : vector<2x64xf32>
    %125 = arith.mulf %120, %124 : vector<2x64xf32>
    %126 = arith.addf %98, %125 : vector<2x64xf32>
    %cst_22 = arith.constant dense<0.000000e+00> : vector<2x256xf32>
    %127 = tpu.matmul %125, %8, %cst_22 {dimension_numbers = #tpu.dot_dimension_numbers<[1], [0], [0], [1], [0, 0, 1, 1], [], []>} : vector<2x64xf32>, vector<64x256xf32>, vector<2x256xf32> -> vector<2x256xf32>
    %128 = arith.addf %42, %127 : vector<2x256xf32>
    %129 = vector.extract_strided_slice %128 {offsets = [0, 0], sizes = [2, 64], strides = [1, 1]} : vector<2x256xf32> to vector<2x64xf32>
    %130 = arith.negf %129 : vector<2x64xf32>
    %131 = math.exp %130 : vector<2x64xf32>
    %cst_23 = arith.constant 1.000000e+00 : f32
    %132 = vector.broadcast %cst_23 : f32 to vector<2x64xf32>
    %133 = arith.addf %132, %131 : vector<2x64xf32>
    %134 = arith.divf %132, %133 : vector<2x64xf32>
    %135 = vector.extract_strided_slice %128 {offsets = [0, 64], sizes = [2, 64], strides = [1, 1]} : vector<2x256xf32> to vector<2x64xf32>
    %136 = arith.negf %135 : vector<2x64xf32>
    %137 = math.exp %136 : vector<2x64xf32>
    %cst_24 = arith.constant 1.000000e+00 : f32
    %138 = vector.broadcast %cst_24 : f32 to vector<2x64xf32>
    %139 = arith.addf %138, %137 : vector<2x64xf32>
    %140 = arith.divf %138, %139 : vector<2x64xf32>
    %141 = vector.extract_strided_slice %128 {offsets = [0, 128], sizes = [2, 64], strides = [1, 1]} : vector<2x256xf32> to vector<2x64xf32>
    %142 = math.tanh %141 : vector<2x64xf32>
    %143 = vector.extract_strided_slice %128 {offsets = [0, 192], sizes = [2, 64], strides = [1, 1]} : vector<2x256xf32> to vector<2x64xf32>
    %144 = arith.negf %143 : vector<2x64xf32>
    %145 = math.exp %144 : vector<2x64xf32>
    %cst_25 = arith.constant 1.000000e+00 : f32
    %146 = vector.broadcast %cst_25 : f32 to vector<2x64xf32>
    %147 = arith.addf %146, %145 : vector<2x64xf32>
    %148 = arith.divf %146, %147 : vector<2x64xf32>
    %149 = arith.mulf %140, %123 : vector<2x64xf32>
    %150 = arith.mulf %134, %142 : vector<2x64xf32>
    %151 = arith.addf %149, %150 : vector<2x64xf32>
    %152 = math.tanh %151 : vector<2x64xf32>
    %153 = arith.mulf %148, %152 : vector<2x64xf32>
    %154 = arith.addf %126, %153 : vector<2x64xf32>
    %cst_26 = arith.constant dense<0.000000e+00> : vector<2x256xf32>
    %155 = tpu.matmul %153, %8, %cst_26 {dimension_numbers = #tpu.dot_dimension_numbers<[1], [0], [0], [1], [0, 0, 1, 1], [], []>} : vector<2x64xf32>, vector<64x256xf32>, vector<2x256xf32> -> vector<2x256xf32>
    %156 = arith.addf %47, %155 : vector<2x256xf32>
    %157 = vector.extract_strided_slice %156 {offsets = [0, 0], sizes = [2, 64], strides = [1, 1]} : vector<2x256xf32> to vector<2x64xf32>
    %158 = arith.negf %157 : vector<2x64xf32>
    %159 = math.exp %158 : vector<2x64xf32>
    %cst_27 = arith.constant 1.000000e+00 : f32
    %160 = vector.broadcast %cst_27 : f32 to vector<2x64xf32>
    %161 = arith.addf %160, %159 : vector<2x64xf32>
    %162 = arith.divf %160, %161 : vector<2x64xf32>
    %163 = vector.extract_strided_slice %156 {offsets = [0, 64], sizes = [2, 64], strides = [1, 1]} : vector<2x256xf32> to vector<2x64xf32>
    %164 = arith.negf %163 : vector<2x64xf32>
    %165 = math.exp %164 : vector<2x64xf32>
    %cst_28 = arith.constant 1.000000e+00 : f32
    %166 = vector.broadcast %cst_28 : f32 to vector<2x64xf32>
    %167 = arith.addf %166, %165 : vector<2x64xf32>
    %168 = arith.divf %166, %167 : vector<2x64xf32>
    %169 = vector.extract_strided_slice %156 {offsets = [0, 128], sizes = [2, 64], strides = [1, 1]} : vector<2x256xf32> to vector<2x64xf32>
    %170 = math.tanh %169 : vector<2x64xf32>
    %171 = vector.extract_strided_slice %156 {offsets = [0, 192], sizes = [2, 64], strides = [1, 1]} : vector<2x256xf32> to vector<2x64xf32>
    %172 = arith.negf %171 : vector<2x64xf32>
    %173 = math.exp %172 : vector<2x64xf32>
    %cst_29 = arith.constant 1.000000e+00 : f32
    %174 = vector.broadcast %cst_29 : f32 to vector<2x64xf32>
    %175 = arith.addf %174, %173 : vector<2x64xf32>
    %176 = arith.divf %174, %175 : vector<2x64xf32>
    %177 = arith.mulf %168, %151 : vector<2x64xf32>
    %178 = arith.mulf %162, %170 : vector<2x64xf32>
    %179 = arith.addf %177, %178 : vector<2x64xf32>
    %180 = math.tanh %179 : vector<2x64xf32>
    %181 = arith.mulf %176, %180 : vector<2x64xf32>
    %182 = arith.addf %154, %181 : vector<2x64xf32>
    %cst_30 = arith.constant dense<0.000000e+00> : vector<2x256xf32>
    %183 = tpu.matmul %181, %8, %cst_30 {dimension_numbers = #tpu.dot_dimension_numbers<[1], [0], [0], [1], [0, 0, 1, 1], [], []>} : vector<2x64xf32>, vector<64x256xf32>, vector<2x256xf32> -> vector<2x256xf32>
    %184 = arith.addf %52, %183 : vector<2x256xf32>
    %185 = vector.extract_strided_slice %184 {offsets = [0, 0], sizes = [2, 64], strides = [1, 1]} : vector<2x256xf32> to vector<2x64xf32>
    %186 = arith.negf %185 : vector<2x64xf32>
    %187 = math.exp %186 : vector<2x64xf32>
    %cst_31 = arith.constant 1.000000e+00 : f32
    %188 = vector.broadcast %cst_31 : f32 to vector<2x64xf32>
    %189 = arith.addf %188, %187 : vector<2x64xf32>
    %190 = arith.divf %188, %189 : vector<2x64xf32>
    %191 = vector.extract_strided_slice %184 {offsets = [0, 64], sizes = [2, 64], strides = [1, 1]} : vector<2x256xf32> to vector<2x64xf32>
    %192 = arith.negf %191 : vector<2x64xf32>
    %193 = math.exp %192 : vector<2x64xf32>
    %cst_32 = arith.constant 1.000000e+00 : f32
    %194 = vector.broadcast %cst_32 : f32 to vector<2x64xf32>
    %195 = arith.addf %194, %193 : vector<2x64xf32>
    %196 = arith.divf %194, %195 : vector<2x64xf32>
    %197 = vector.extract_strided_slice %184 {offsets = [0, 128], sizes = [2, 64], strides = [1, 1]} : vector<2x256xf32> to vector<2x64xf32>
    %198 = math.tanh %197 : vector<2x64xf32>
    %199 = vector.extract_strided_slice %184 {offsets = [0, 192], sizes = [2, 64], strides = [1, 1]} : vector<2x256xf32> to vector<2x64xf32>
    %200 = arith.negf %199 : vector<2x64xf32>
    %201 = math.exp %200 : vector<2x64xf32>
    %cst_33 = arith.constant 1.000000e+00 : f32
    %202 = vector.broadcast %cst_33 : f32 to vector<2x64xf32>
    %203 = arith.addf %202, %201 : vector<2x64xf32>
    %204 = arith.divf %202, %203 : vector<2x64xf32>
    %205 = arith.mulf %196, %179 : vector<2x64xf32>
    %206 = arith.mulf %190, %198 : vector<2x64xf32>
    %207 = arith.addf %205, %206 : vector<2x64xf32>
    %208 = math.tanh %207 : vector<2x64xf32>
    %209 = arith.mulf %204, %208 : vector<2x64xf32>
    %210 = arith.addf %182, %209 : vector<2x64xf32>
    %cst_34 = arith.constant dense<0.000000e+00> : vector<2x256xf32>
    %211 = tpu.matmul %209, %8, %cst_34 {dimension_numbers = #tpu.dot_dimension_numbers<[1], [0], [0], [1], [0, 0, 1, 1], [], []>} : vector<2x64xf32>, vector<64x256xf32>, vector<2x256xf32> -> vector<2x256xf32>
    %212 = arith.addf %57, %211 : vector<2x256xf32>
    %213 = vector.extract_strided_slice %212 {offsets = [0, 0], sizes = [2, 64], strides = [1, 1]} : vector<2x256xf32> to vector<2x64xf32>
    %214 = arith.negf %213 : vector<2x64xf32>
    %215 = math.exp %214 : vector<2x64xf32>
    %cst_35 = arith.constant 1.000000e+00 : f32
    %216 = vector.broadcast %cst_35 : f32 to vector<2x64xf32>
    %217 = arith.addf %216, %215 : vector<2x64xf32>
    %218 = arith.divf %216, %217 : vector<2x64xf32>
    %219 = vector.extract_strided_slice %212 {offsets = [0, 64], sizes = [2, 64], strides = [1, 1]} : vector<2x256xf32> to vector<2x64xf32>
    %220 = arith.negf %219 : vector<2x64xf32>
    %221 = math.exp %220 : vector<2x64xf32>
    %cst_36 = arith.constant 1.000000e+00 : f32
    %222 = vector.broadcast %cst_36 : f32 to vector<2x64xf32>
    %223 = arith.addf %222, %221 : vector<2x64xf32>
    %224 = arith.divf %222, %223 : vector<2x64xf32>
    %225 = vector.extract_strided_slice %212 {offsets = [0, 128], sizes = [2, 64], strides = [1, 1]} : vector<2x256xf32> to vector<2x64xf32>
    %226 = math.tanh %225 : vector<2x64xf32>
    %227 = vector.extract_strided_slice %212 {offsets = [0, 192], sizes = [2, 64], strides = [1, 1]} : vector<2x256xf32> to vector<2x64xf32>
    %228 = arith.negf %227 : vector<2x64xf32>
    %229 = math.exp %228 : vector<2x64xf32>
    %cst_37 = arith.constant 1.000000e+00 : f32
    %230 = vector.broadcast %cst_37 : f32 to vector<2x64xf32>
    %231 = arith.addf %230, %229 : vector<2x64xf32>
    %232 = arith.divf %230, %231 : vector<2x64xf32>
    %233 = arith.mulf %224, %207 : vector<2x64xf32>
    %234 = arith.mulf %218, %226 : vector<2x64xf32>
    %235 = arith.addf %233, %234 : vector<2x64xf32>
    %236 = math.tanh %235 : vector<2x64xf32>
    %237 = arith.mulf %232, %236 : vector<2x64xf32>
    %238 = arith.addf %210, %237 : vector<2x64xf32>
    %cst_38 = arith.constant dense<0.000000e+00> : vector<2x256xf32>
    %239 = tpu.matmul %237, %8, %cst_38 {dimension_numbers = #tpu.dot_dimension_numbers<[1], [0], [0], [1], [0, 0, 1, 1], [], []>} : vector<2x64xf32>, vector<64x256xf32>, vector<2x256xf32> -> vector<2x256xf32>
    %240 = arith.addf %62, %239 : vector<2x256xf32>
    %241 = vector.extract_strided_slice %240 {offsets = [0, 0], sizes = [2, 64], strides = [1, 1]} : vector<2x256xf32> to vector<2x64xf32>
    %242 = arith.negf %241 : vector<2x64xf32>
    %243 = math.exp %242 : vector<2x64xf32>
    %cst_39 = arith.constant 1.000000e+00 : f32
    %244 = vector.broadcast %cst_39 : f32 to vector<2x64xf32>
    %245 = arith.addf %244, %243 : vector<2x64xf32>
    %246 = arith.divf %244, %245 : vector<2x64xf32>
    %247 = vector.extract_strided_slice %240 {offsets = [0, 64], sizes = [2, 64], strides = [1, 1]} : vector<2x256xf32> to vector<2x64xf32>
    %248 = arith.negf %247 : vector<2x64xf32>
    %249 = math.exp %248 : vector<2x64xf32>
    %cst_40 = arith.constant 1.000000e+00 : f32
    %250 = vector.broadcast %cst_40 : f32 to vector<2x64xf32>
    %251 = arith.addf %250, %249 : vector<2x64xf32>
    %252 = arith.divf %250, %251 : vector<2x64xf32>
    %253 = vector.extract_strided_slice %240 {offsets = [0, 128], sizes = [2, 64], strides = [1, 1]} : vector<2x256xf32> to vector<2x64xf32>
    %254 = math.tanh %253 : vector<2x64xf32>
    %255 = vector.extract_strided_slice %240 {offsets = [0, 192], sizes = [2, 64], strides = [1, 1]} : vector<2x256xf32> to vector<2x64xf32>
    %256 = arith.negf %255 : vector<2x64xf32>
    %257 = math.exp %256 : vector<2x64xf32>
    %cst_41 = arith.constant 1.000000e+00 : f32
    %258 = vector.broadcast %cst_41 : f32 to vector<2x64xf32>
    %259 = arith.addf %258, %257 : vector<2x64xf32>
    %260 = arith.divf %258, %259 : vector<2x64xf32>
    %261 = arith.mulf %252, %235 : vector<2x64xf32>
    %262 = arith.mulf %246, %254 : vector<2x64xf32>
    %263 = arith.addf %261, %262 : vector<2x64xf32>
    %264 = math.tanh %263 : vector<2x64xf32>
    %265 = arith.mulf %260, %264 : vector<2x64xf32>
    %266 = arith.addf %238, %265 : vector<2x64xf32>
    %cst_42 = arith.constant dense<0.000000e+00> : vector<2x256xf32>
    %267 = tpu.matmul %265, %8, %cst_42 {dimension_numbers = #tpu.dot_dimension_numbers<[1], [0], [0], [1], [0, 0, 1, 1], [], []>} : vector<2x64xf32>, vector<64x256xf32>, vector<2x256xf32> -> vector<2x256xf32>
    %268 = arith.addf %67, %267 : vector<2x256xf32>
    %269 = vector.extract_strided_slice %268 {offsets = [0, 0], sizes = [2, 64], strides = [1, 1]} : vector<2x256xf32> to vector<2x64xf32>
    %270 = arith.negf %269 : vector<2x64xf32>
    %271 = math.exp %270 : vector<2x64xf32>
    %cst_43 = arith.constant 1.000000e+00 : f32
    %272 = vector.broadcast %cst_43 : f32 to vector<2x64xf32>
    %273 = arith.addf %272, %271 : vector<2x64xf32>
    %274 = arith.divf %272, %273 : vector<2x64xf32>
    %275 = vector.extract_strided_slice %268 {offsets = [0, 64], sizes = [2, 64], strides = [1, 1]} : vector<2x256xf32> to vector<2x64xf32>
    %276 = arith.negf %275 : vector<2x64xf32>
    %277 = math.exp %276 : vector<2x64xf32>
    %cst_44 = arith.constant 1.000000e+00 : f32
    %278 = vector.broadcast %cst_44 : f32 to vector<2x64xf32>
    %279 = arith.addf %278, %277 : vector<2x64xf32>
    %280 = arith.divf %278, %279 : vector<2x64xf32>
    %281 = vector.extract_strided_slice %268 {offsets = [0, 128], sizes = [2, 64], strides = [1, 1]} : vector<2x256xf32> to vector<2x64xf32>
    %282 = math.tanh %281 : vector<2x64xf32>
    %283 = vector.extract_strided_slice %268 {offsets = [0, 192], sizes = [2, 64], strides = [1, 1]} : vector<2x256xf32> to vector<2x64xf32>
    %284 = arith.negf %283 : vector<2x64xf32>
    %285 = math.exp %284 : vector<2x64xf32>
    %cst_45 = arith.constant 1.000000e+00 : f32
    %286 = vector.broadcast %cst_45 : f32 to vector<2x64xf32>
    %287 = arith.addf %286, %285 : vector<2x64xf32>
    %288 = arith.divf %286, %287 : vector<2x64xf32>
    %289 = arith.mulf %280, %263 : vector<2x64xf32>
    %290 = arith.mulf %274, %282 : vector<2x64xf32>
    %291 = arith.addf %289, %290 : vector<2x64xf32>
    %292 = math.tanh %291 : vector<2x64xf32>
    %293 = arith.mulf %288, %292 : vector<2x64xf32>
    %294 = arith.addf %266, %293 : vector<2x64xf32>
    %cst_46 = arith.constant 1.250000e-01 : f32
    %295 = vector.broadcast %cst_46 : f32 to vector<2x64xf32>
    %296 = arith.mulf %294, %295 : vector<2x64xf32>
    %c0_47 = arith.constant 0 : index
    %c0_48 = arith.constant 0 : index
    %297 = vector.load %arg4[%c0_47, %c0_48] : memref<64x4xf32, #tpu.memory_space<vmem>>, vector<64x4xf32>
    %cst_49 = arith.constant dense<0.000000e+00> : vector<2x4xf32>
    %298 = tpu.matmul %296, %297, %cst_49 {dimension_numbers = #tpu.dot_dimension_numbers<[1], [0], [0], [1], [0, 0, 1, 1], [], []>} : vector<2x64xf32>, vector<64x4xf32>, vector<2x4xf32> -> vector<2x4xf32>
    %c0_50 = arith.constant 0 : index
    %c0_51 = arith.constant 0 : index
    %299 = vector.load %arg5[%c0_50, %c0_51] : memref<1x4xf32, #tpu.memory_space<vmem>>, vector<1x4xf32>
    %300 = vector.broadcast %299 : vector<1x4xf32> to vector<2x4xf32>
    %301 = arith.addf %298, %300 : vector<2x4xf32>
    %c0_52 = arith.constant 0 : index
    %c0_53 = arith.constant 0 : index
    %302 = vector.load %arg6[%c0_52, %c0_53] : memref<2x4xf32, #tpu.memory_space<vmem>>, vector<2x4xf32>
    tpu.vector_store %arg6[%c0_52, %c0_53], %301 {strides = array<i32>} : memref<2x4xf32, #tpu.memory_space<vmem>>, vector<2x4xf32>,
    return
  }
}

</mosaic_0001>

<bundles_post_ra>
// kernel: tpu_custom_call.1
= control target key start
LH: loop header
LB: loop body
LE: loop exit
PB: predicated region body
PF: predicated region fallthrough
CT: control target
= control target key end

     0   :  { %11 = vsyncpa [#allocation3], 0  ;;  %s1822_s0 = inlined_call_operand.vmem [shape: f32[2,8,64], index: 0, kind: input, shape index: {}]   ;;  %s1823_s1 = inlined_call_operand.hbm [shape: f32[64,256], index: 1, kind: input, shape index: {}]   ;;  %s1824_s2 = inlined_call_operand.hbm [shape: f32[64,256], index: 2, kind: input, shape index: {}]   ;;  %s1825_s3 = inlined_call_operand.vmem [shape: f32[1,256], index: 3, kind: input, shape index: {}]   ;;  %s1826_s4 = inlined_call_operand.vmem [shape: f32[64,4], index: 4, kind: input, shape index: {}]   ;;  %s1827_s5 = inlined_call_operand.vmem [shape: f32[1,4], index: 5, kind: input, shape index: {}]   ;;  %s1828_s6 = inlined_call_operand.hbm [shape: f32[2,4], index: 6, kind: output, shape index: {}]  }
   0x1   :  { %12 = vsyncpa [#allocation6], 0 }
   0x2   :  { %13 = vsyncpa [#allocation4], 0  ;;  %s20_s23 = sshll.u32 %s1823_s1, 4  ;;  %s1300_s24 = smov [#allocation2]   ;;  %s21_s23 = int_to_ptr.hbm [resolvable:$true] %s20_s23 }
   0x3   :  { %s22_s25 = sshll.u32 %s1300_s24, 4  ;;  %s33_s28 = sshll.u32 %s1824_s2, 4  ;;  %s23_s25 = int_to_ptr.vmem [resolvable:$true] %s22_s25  ;;  %s34_s28 = int_to_ptr.hbm [resolvable:$true] %s33_s28 }
   0x4   :  { %s1301_s29 = smov 256   ;;  %s1302_s30 = smov 16  }
   0x5   :  { %28 = dma.hbm_to_vmem [thread:$0]  %s21_s23, 2048, %s23_s25, [#allocation3], %s1301_s29, %s1301_s29, %s1302_s30  }
   0x6   :  { %s1303_s7 = smov [#allocation5]  }
   0x7   :  { %s35_s8 = sshll.u32 %s1303_s7, 4  ;;  %s36_s8 = int_to_ptr.vmem [resolvable:$true] %s35_s8 }
   0x8   :  { %41 = dma.hbm_to_vmem [thread:$0]  %s34_s28, 2048, %s36_s8, [#allocation6], %s1301_s29, %s1301_s29, %s1302_s30  }
   0x9   :  { %1294 = dma.done.wait [#allocation3], 2048  }
   0xa   :  { %1295 = vsyncadd [#allocation3], 4294965248 }
   0xb   :  { %1296 = dma.done.wait [#allocation6], 2048  }
   0xc   :  { %1297 = vsyncadd [#allocation6], 4294965248  ;;  %v72_v0 = vld [vmem:[#allocation2 + $0x70] sm:$0xff]  ;;  %v73_v1 = vld [vmem:[#allocation2 + $0x78] sm:$0xff]  ;;  %vm80_vm0 = vcmask 523264   ;;  %v1304_v33 = vmov 0.0   ;;  %v149_v35 = vlaneseq }
   0xd   :  { %v70_v2 = vld [vmem:[#allocation2 + $0x60] sm:$0xff]  ;;  %95 = vmatpush.msra.mxu0 %v72_v0  ;;  %118 = vmatpush.msra.mxu1 %v73_v1  ;;  %v71_v3 = vld [vmem:[#allocation2 + $0x68] sm:$0xff]  ;;  %v68_v4 = vld [vmem:[#allocation2 + $0x50] sm:$0xff]  ;;  %vm183_vm2 = vcmask 1041409   ;;  %s1306_s29 = smov [#allocation7]   ;;  %s1072_s1 = sshll.u32 %s1828_s6, 4  ;;  %s1073_s1 = int_to_ptr.hbm [resolvable:$true] %s1072_s1 }
   0xe   :  { %v69_v5 = vld [vmem:[#allocation2 + $0x58] sm:$0xff]  ;;  %v1348_v6 = vld [vmem:[#allocation5 + $0x70] sm:$0xff]  ;;  %v66_v8 = vld [vmem:[#allocation2 + $0x40] sm:$0xff]  ;;  %v150_v36 = vand.u32 127, %v149_v35  ;;  %s1070_s30 = sshll.u32 %s1306_s29, 4  ;;  %s1071_s30 = int_to_ptr.vmem [resolvable:$true] %s1070_s30 }
   0xf   :  { %96 = vmatpush.msra.mxu0 %v70_v2  ;;  %119 = vmatpush.msra.mxu1 %v71_v3  ;;  %v1350_v7 = vld [vmem:[#allocation5 + $0x78] sm:$0xff]  ;;  %v67_v9 = vld [vmem:[#allocation2 + $0x48] sm:$0xff]  ;;  %v1354_v10 = vld [vmem:[#allocation5 + $0x60] sm:$0xff] }
  0x10   :  { %270 = vmatpush.msra.mxu2 %v1348_v6  ;;  %290 = vmatpush.msra.mxu3 %v1350_v7  ;;  %v64_v11 = vld [vmem:[#allocation2 + $0x30] sm:$0xff]  ;;  %v1356_v12 = vld [vmem:[#allocation5 + $0x68] sm:$0xff]  ;;  %v65_v13 = vld [vmem:[#allocation2 + $0x38] sm:$0xff]  ;;  %v151_v42 = vadd.s32 128, %v150_v36  ;;  %v156_v43 = vand.u32 63, %v150_v36 }
  0x11   :  { %97 = vmatpush.msra.mxu0 %v68_v4  ;;  %120 = vmatpush.msra.mxu1 %v69_v5  ;;  %v1360_v14 = vld [vmem:[#allocation5 + $0x50] sm:$0xff]  ;;  %v1362_v15 = vld [vmem:[#allocation5 + $0x58] sm:$0xff]  ;;  %v1364_v16 = vld [vmem:[#allocation5 + $0x40] sm:$0xff] }
  0x12   :  { %271 = vmatpush.msra.mxu2 %v1354_v10  ;;  %291 = vmatpush.msra.mxu3 %v1356_v12  ;;  %v1366_v17 = vld [vmem:[#allocation5 + $0x48] sm:$0xff]  ;;  %v62_v18 = vld [vmem:[#allocation2 + $0x20] sm:$0xff]  ;;  %v1370_v20 = vld [vmem:[#allocation5 + $0x30] sm:$0xff]  ;;  %v163_v46 = vand.u32 63, %v151_v42  ;;  %vm1477_vm1 = vcmp.lt.s32.totalorder %v156_v43, 32 }
  0x13   :  { %98 = vmatpush.msra.mxu0 %v66_v8  ;;  %121 = vmatpush.msra.mxu1 %v67_v9  ;;  %v63_v19 = vld [vmem:[#allocation2 + $0x28] sm:$0xff]  ;;  %v1372_v21 = vld [vmem:[#allocation5 + $0x38] sm:$0xff]  ;;  %v60_v22 = vld [vmem:[#allocation2 + $0x10] sm:$0xff] }
  0x14   :  { %272 = vmatpush.msra.mxu2 %v1360_v14  ;;  %292 = vmatpush.msra.mxu3 %v1362_v15  ;;  %v61_v23 = vld [vmem:[#allocation2 + $0x18] sm:$0xff]  ;;  %v1376_v24 = vld [vmem:[#allocation5 + $0x20] sm:$0xff]  ;;  %v1378_v25 = vld [vmem:[#allocation5 + $0x28] sm:$0xff]  ;;  %vm1482_vm3 = vcmp.lt.s32.totalorder %v163_v46, 32 }
  0x15   :  { %99 = vmatpush.msra.mxu0 %v64_v11  ;;  %122 = vmatpush.msra.mxu1 %v65_v13  ;;  %v58_v26 = vld [vmem:[#allocation2] sm:$0xff]  ;;  %v59_v27 = vld [vmem:[#allocation2 + $0x8] sm:$0xff]  ;;  %v1387_v29 = vld [vmem:[#allocation5 + $0x10] sm:$0xff] }
  0x16   :  { %273 = vmatpush.msra.mxu2 %v1364_v16  ;;  %293 = vmatpush.msra.mxu3 %v1366_v17  ;;  %v56_v28 = vld [vmem:[%s1822_s0] sm:$0xff]  ;;  %v1389_v30 = vld [vmem:[#allocation5 + $0x18] sm:$0xff]  ;;  %v1395_v32 = vld [vmem:[#allocation5 + $0x8] sm:$0xff] }
  0x17   :  { %100 = vmatpush.msra.mxu0 %v62_v18  ;;  %123 = vmatpush.msra.mxu1 %v63_v19  ;;  %v1393_v31 = vld [vmem:[#allocation5] sm:$0xff]  ;;  %v57_v34 = vld [vmem:[%s1822_s0 + $0x8] sm:$0xff] }
  0x18   :  { %274 = vmatpush.msra.mxu2 %v1370_v20  ;;  %294 = vmatpush.msra.mxu3 %v1372_v21  ;;  %v74_v37 = vld [vmem:[%s1825_s3] sm:$0x3]  ;;  %s1305_s3 = smov 64  }
  0x19   :  { %101 = vmatpush.msra.mxu0 %v60_v22  ;;  %124 = vmatpush.msra.mxu1 %v61_v23  ;;  %v76_v38 = vperm.slane %v74_v37, 0  ;;  %v77_v40 = vperm.slane %v74_v37, 1 }
  0x1a   :  { %275 = vmatpush.msra.mxu2 %v1376_v24  ;;  %295 = vmatpush.msra.mxu3 %v1378_v25 }
  0x1b   :  { %102 = vmatpush.msra.mxu0 %v58_v26  ;;  %125 = vmatpush.msra.mxu1 %v59_v27 }
  0x1c   :  { %1083 = vmatmul.msk.f32.vlgmr.msra.gmra.mxu0 %vm80_vm0, %v56_v28  ;;  %1085 = vmatmul.msk.f32.vlgmr.msra.gmra.mxu1 %vm80_vm0, %v56_v28 }
  0x1d   :  { %276 = vmatpush.msra.mxu2 %v1387_v29  ;;  %296 = vmatpush.msra.mxu3 %v1389_v30 }
  0x1e   :  { %366 = vmatpush.msrb.mxu0 %v1348_v6  ;;  %386 = vmatpush.msrb.mxu1 %v1350_v7 }
  0x1f   :  { %277 = vmatpush.msra.mxu2 %v1393_v31  ;;  %297 = vmatpush.msra.mxu3 %v1395_v32 }
  0x20   :  { %278 = vmatmul.f32.vlgmr.msra.gmra.mxu2 %v1304_v33  ;;  %298 = vmatmul.f32.vlgmr.msra.gmra.mxu3 %v1304_v33 }
  0x21   :  { %367 = vmatpush.msrb.mxu0 %v1354_v10  ;;  %387 = vmatpush.msrb.mxu1 %v1356_v12 }
  0x22   :  { %462 = vmatpush.msrb.mxu2 %v1348_v6  ;;  %482 = vmatpush.msrb.mxu3 %v1350_v7 }
  0x23   :  { %368 = vmatpush.msrb.mxu0 %v1360_v14  ;;  %388 = vmatpush.msrb.mxu1 %v1362_v15 }
  0x24   :  { %1084 = vmatmul.msk.f32.gmra.mxu0 %vm80_vm0, %v57_v34  ;;  %1086 = vmatmul.msk.f32.gmra.mxu1 %vm80_vm0, %v57_v34 }
  0x25   :  { %369 = vmatpush.msrb.mxu0 %v1364_v16  ;;  %389 = vmatpush.msrb.mxu1 %v1366_v17 }
  0x26   :  { %463 = vmatpush.msrb.mxu2 %v1354_v10  ;;  %483 = vmatpush.msrb.mxu3 %v1356_v12 }
  0x27   :  { %370 = vmatpush.msrb.mxu0 %v1370_v20  ;;  %390 = vmatpush.msrb.mxu1 %v1372_v21 }
  0x28   :  { %464 = vmatpush.msrb.mxu2 %v1360_v14  ;;  %484 = vmatpush.msrb.mxu3 %v1362_v15 }
  0x29   :  { %371 = vmatpush.msrb.mxu0 %v1376_v24  ;;  %391 = vmatpush.msrb.mxu1 %v1378_v25 }
  0x2a   :  { %465 = vmatpush.msrb.mxu2 %v1364_v16  ;;  %485 = vmatpush.msrb.mxu3 %v1366_v17 }
  0x2b   :  { %372 = vmatpush.msrb.mxu0 %v1387_v29  ;;  %392 = vmatpush.msrb.mxu1 %v1389_v30 }
  0x2c   :  { %466 = vmatpush.msrb.mxu2 %v1370_v20  ;;  %486 = vmatpush.msrb.mxu3 %v1372_v21 }
  0x2d   :  { %373 = vmatpush.msrb.mxu0 %v1393_v31  ;;  %393 = vmatpush.msrb.mxu1 %v1395_v32 }
  0x2e   :  { %467 = vmatpush.msrb.mxu2 %v1376_v24  ;;  %487 = vmatpush.msrb.mxu3 %v1378_v25 }
  0x2f   :  { %558 = vmatpush.msra.mxu0 %v1348_v6  ;;  %578 = vmatpush.msra.mxu1 %v1350_v7 }
  0x30   :  { %468 = vmatpush.msrb.mxu2 %v1387_v29  ;;  %488 = vmatpush.msrb.mxu3 %v1389_v30 }
  0x31   :  { %559 = vmatpush.msra.mxu0 %v1354_v10  ;;  %579 = vmatpush.msra.mxu1 %v1356_v12 }
  0x32   :  { %469 = vmatpush.msrb.mxu2 %v1393_v31  ;;  %489 = vmatpush.msrb.mxu3 %v1395_v32 }
  0x33   :  { %560 = vmatpush.msra.mxu0 %v1360_v14  ;;  %580 = vmatpush.msra.mxu1 %v1362_v15 }
  0x34   :  { %654 = vmatpush.msra.mxu2 %v1348_v6  ;;  %674 = vmatpush.msra.mxu3 %v1350_v7 }
  0x35   :  { %561 = vmatpush.msra.mxu0 %v1364_v16  ;;  %581 = vmatpush.msra.mxu1 %v1366_v17 }
  0x36   :  { %655 = vmatpush.msra.mxu2 %v1354_v10  ;;  %675 = vmatpush.msra.mxu3 %v1356_v12 }
  0x37   :  { %562 = vmatpush.msra.mxu0 %v1370_v20  ;;  %582 = vmatpush.msra.mxu1 %v1372_v21 }
  0x38   :  { %656 = vmatpush.msra.mxu2 %v1360_v14  ;;  %676 = vmatpush.msra.mxu3 %v1362_v15 }
  0x39   :  { %563 = vmatpush.msra.mxu0 %v1376_v24  ;;  %583 = vmatpush.msra.mxu1 %v1378_v25 }
  0x3a   :  { %657 = vmatpush.msra.mxu2 %v1364_v16  ;;  %677 = vmatpush.msra.mxu3 %v1366_v17 }
  0x3b   :  { %564 = vmatpush.msra.mxu0 %v1387_v29  ;;  %584 = vmatpush.msra.mxu1 %v1389_v30 }
  0x3c   :  { %658 = vmatpush.msra.mxu2 %v1370_v20  ;;  %678 = vmatpush.msra.mxu3 %v1372_v21 }
  0x3d   :  { %565 = vmatpush.msra.mxu0 %v1393_v31  ;;  %585 = vmatpush.msra.mxu1 %v1395_v32 }
  0x3e   :  { %659 = vmatpush.msra.mxu2 %v1376_v24  ;;  %679 = vmatpush.msra.mxu3 %v1378_v25 }
  0x40   :  { %660 = vmatpush.msra.mxu2 %v1387_v29  ;;  %680 = vmatpush.msra.mxu3 %v1389_v30 }
  0x42   :  { %661 = vmatpush.msra.mxu2 %v1393_v31  ;;  %681 = vmatpush.msra.mxu3 %v1395_v32 }
  0x99   :  { %v104_v39 = vpop.f32.mrf.mxu0  ;;  %v127_v41 = vpop.f32.mrf.mxu1 }
  0x9a   :  { %v1473_v44 = vadd.f32 %v104_v39, %v76_v38  ;;  %v1475_v45 = vadd.f32 %v127_v41, %v77_v40 }
  0x9c   :  { %v189_v50 = vrot.slane %v1473_v44, 7  ;;  %v192_v52 = vrot.slane %v1475_v45, 7  ;;  %v201_v53 = vrot.slane %v1475_v45, 1  ;;  %v199_v56 = vrot.slane %v1473_v44, 1 }
  0x9d   :  { %v205_v57 = vrot.slane %v1473_v44, 6  ;;  %v208_v58 = vrot.slane %v1475_v45, 6  ;;  %v215_v59 = vrot.slane %v1473_v44, 2  ;;  %v223_v60 = vrot.slane %v1473_v44, 5 }
  0x9e   :  { %v218_v61 = vrot.slane %v1475_v45, 2  ;;  %v226_v0 = vrot.slane %v1475_v45, 5  ;;  %v233_v1 = vrot.slane %v1473_v44, 3  ;;  %v241_v18 = vrot.slane %v1473_v44, 4 }
  0x9f   :  { %v236_v26 = vrot.slane %v1475_v45, 3  ;;  %v244_v42 = vrot.slane %v1475_v45, 4 }
  0xa1   :  { %v107_v48 = vpop.f32.mrf.mxu0  ;;  %v130_v49 = vpop.f32.mrf.mxu1 }
  0xa2   :  { %v108_v54 = vadd.f32 %v107_v48, %v76_v38  ;;  %v131_v55 = vadd.f32 %v130_v49, %v77_v40 }
  0xa3   :  { %v279_v2 = vpop.f32.mrf.mxu2 }
  0xa4   :  { %v182_v62 = vrot.slane %v108_v54, 7  ;;  %v190_v63 = vrot.slane %v108_v54, 6  ;;  %v1497_v3 = vsel %vm183_vm2, %v108_v54, %v199_v56  ;;  %v206_v4 = vrot.slane %v108_v54, 5 }
  0xa5   :  { %v1500_v5 = vsel %vm183_vm2, %v131_v55, %v201_v53  ;;  %v209_v8 = vrot.slane %v131_v55, 5  ;;  %v185_v13 = vrot.slane %v131_v55, 7  ;;  %v193_v28 = vrot.slane %v131_v55, 6 }
  0xa6   :  { %v1504_v9 = vsel %vm183_vm2, %v182_v62, %v1473_v44  ;;  %v1507_v11 = vsel %vm183_vm2, %v190_v63, %v189_v50  ;;  %v1515_v22 = vsel %vm183_vm2, %v206_v4, %v205_v57  ;;  %v216_v35 = vrot.slane %v108_v54, 1 }
  0xa7   :  { %v197_v19 = vsel %vm1477_vm1, %v1504_v9, %v1507_v11  ;;  %v1518_v23 = vsel %vm183_vm2, %v209_v8, %v208_v58  ;;  %v213_v33 = vsel %vm1477_vm1, %v1497_v3, %v1515_v22  ;;  %v224_v36 = vrot.slane %v108_v54, 4 }
  0xa8   :  { %v302_v27 = vadd.f32 %v279_v2, %v197_v19  ;;  %v214_v34 = vsel %vm1482_vm3, %v1500_v5, %v1518_v23  ;;  %v219_v37 = vrot.slane %v131_v55, 1  ;;  %v227_v38 = vrot.slane %v131_v55, 4 }
  0xa9   :  { %v1531_v40 = vsel %vm183_vm2, %v185_v13, %v1475_v45  ;;  %v234_v41 = vrot.slane %v108_v54, 2  ;;  %v1535_v43 = vsel %vm183_vm2, %v216_v35, %v215_v59  ;;  %v1538_v44 = vsel %vm183_vm2, %v224_v36, %v223_v60 }
  0xaa   :  { %v1087_v39 = vmul.f32 -1.442695, %v302_v27  ;;  %v1541_v46 = vsel %vm183_vm2, %v219_v37, %v218_v61  ;;  %v1544_v48 = vsel %vm183_vm2, %v227_v38, %v226_v0  ;;  %v231_v49 = vsel %vm1477_vm1, %v1535_v43, %v1538_v44 }
  0xab   :  { %v232_v45 = vsel %vm1482_vm3, %v1541_v46, %v1544_v48  ;;  %v1555_v50 = vsel %vm183_vm2, %v234_v41, %v233_v1  ;;  %v1558_v53 = vsel %vm183_vm2, %v193_v28, %v192_v52  ;;  %v242_v56 = vrot.slane %v108_v54, 3 }
  0xac   :  { %1126 = vpow2.f32 %v1087_v39  ;;  %v237_v57 = vrot.slane %v131_v55, 2  ;;  %v245_v58 = vrot.slane %v131_v55, 3  ;;  %v253_v59 = vsel %vm1477_vm1, %v1538_v44, %v1535_v43 }
  0xad   :  { %v254_v60 = vsel %vm1482_vm3, %v1544_v48, %v1541_v46  ;;  %v255_v61 = vsel %vm1477_vm1, %v1515_v22, %v1497_v3  ;;  %v1577_v54 = vsel %vm183_vm2, %v242_v56, %v241_v18  ;;  %v198_v19 = vsel %vm1482_vm3, %v1531_v40, %v1558_v53 }
  0xae   :  { %v1580_v55 = vsel %vm183_vm2, %v237_v57, %v236_v26  ;;  %v1583_v62 = vsel %vm183_vm2, %v245_v58, %v244_v42  ;;  %v249_v0 = vsel %vm1477_vm1, %v1555_v50, %v1577_v54  ;;  %v251_v2 = vsel %vm1477_vm1, %v1577_v54, %v1555_v50  ;;  %v299_v26 = vpop.f32.mrf.mxu3 }
  0xaf   :  { %v250_v1 = vsel %vm1482_vm3, %v1580_v55, %v1583_v62  ;;  %v252_v4 = vsel %vm1482_vm3, %v1583_v62, %v1580_v55  ;;  %v303_v35 = vadd.f32 %v299_v26, %v198_v19 }
  0xb1   :  { %v1088_v8 = vmul.f32 -1.442695, %v303_v35 }
  0xb2   :  { %v1127_v13 = vpop.eup %1126 }
  0xb3   :  { %v307_v18 = vadd.f32 1.0, %v1127_v13 }
  0xb5   :  { %1128 = vrcp.f32 %v307_v18  ;;  %v319_v37 = vand.u32 2147483648, %v307_v18  ;;  %v317_v39 = vand.u32 2147483647, %v307_v18  ;;  %vm313_vm5 = vweird.f32 %v307_v18 }
  0xb6   :  { %1130 = vtanh.f32 %v303_v35 }
  0xb7   :  { %v320_v42 = vor.u32 1.1754944e-38, %v319_v37  ;;  %vm318_vm7 = vcmp.eq.f32.partialorder %v317_v39, 8.507059e+37  ;;  %1132 = vpow2.f32 %v1088_v8 }
  0xbb   :  { %v1129_v27 = vpop.eup %1128 }
  0xbc   :  { %v309_v28 = vmul.f32 %v1129_v27, %v307_v18  ;;  %vm314_vm4 = vweird.f32 %v1129_v27  ;;  %v1131_v57 = vpop.eup %1130 }
  0xbd   :  { %vm315_vm6 = vmor %vm313_vm5, %vm314_vm4  ;;  %v1133_v19 = vpop.eup %1132 }
  0xbe   :  { %v310_v36 = vsub.f32 1.0, %v309_v28  ;;  %v327_v26 = vadd.f32 1.0, %v1133_v19 }
  0xc0   :  { %v311_v38 = vmul.f32 %v1129_v27, %v310_v36  ;;  %1134 = vrcp.f32 %v327_v26  ;;  %vm333_vm8 = vweird.f32 %v327_v26 }
  0xc2   :  { %v312_v41 = vadd.f32 %v1129_v27, %v311_v38 }
  0xc4   :  { %v316_v56 = vsel %vm315_vm6, %v1129_v27, %v312_v41  ;;  %v339_v27 = vand.u32 2147483648, %v327_v26  ;;  %v337_v41 = vand.u32 2147483647, %v327_v26 }
  0xc5   :  { %v321_v58 = vsel %vm318_vm7, %v320_v42, %v316_v56 }
  0xc6   :  { %v344_v13 = vmul.f32 %v1131_v57, %v321_v58  ;;  %v1135_v28 = vpop.eup %1134  ;;  %v343_v18 = vmul.f32 0.0, %v321_v58  ;;  %v340_v8 = vor.u32 1.1754944e-38, %v339_v27  ;;  %vm338_vm11 = vcmp.eq.f32.partialorder %v337_v41, 8.507059e+37 }
  0xc7   :  { %v329_v36 = vmul.f32 %v1135_v28, %v327_v26  ;;  %vm334_vm9 = vweird.f32 %v1135_v28 }
  0xc8   :  { %346 = vrot.lane.b32.xlu0 %v344_v13, %s1305_s3  ;;  %vm335_vm10 = vmor %vm333_vm8, %vm334_vm9 }
  0xc9   :  { %v330_v63 = vsub.f32 1.0, %v329_v36 }
  0xcb   :  { %v331_v38 = vmul.f32 %v1135_v28, %v330_v63 }
  0xcd   :  { %v332_v39 = vadd.f32 %v1135_v28, %v331_v38 }
  0xcf   :  { %v336_v35 = vsel %vm335_vm10, %v1135_v28, %v332_v39 }
  0xd0   :  { %v341_v56 = vsel %vm338_vm11, %v340_v8, %v336_v35 }
 0x13a   :  { %v347_v52 = vpop.permute.xlu0 %346 }
 0x13b   :  { %v1614_v37 = vadd.f32 %v347_v52, %v343_v18 }
 0x13d   :  { %1136 = vtanh.f32 %v1614_v37 }
 0x143   :  { %v1137_v42 = vpop.eup %1136 }
 0x144   :  { %v1617_v57 = vmul.f32 %v1137_v42, %v341_v56 }
 0x146   :  { %354 = vrot.lane.b32.xlu0 %v1617_v57, %s1305_s3 }
 0x1b8   :  { %v355_v52 = vpop.permute.xlu0 %354 }
 0x1b9   :  { %1089 = vmatmul.msk.f32.vlgmr.msrb.gmra.mxu0 %vm80_vm0, %v355_v52  ;;  %1090 = vmatmul.msk.f32.vlgmr.msrb.gmra.mxu1 %vm80_vm0, %v355_v52 }
 0x1ba   :  { %750 = vmatpush.msrb.mxu0 %v1348_v6  ;;  %770 = vmatpush.msrb.mxu1 %v1350_v7 }
 0x1bc   :  { %751 = vmatpush.msrb.mxu0 %v1354_v10  ;;  %771 = vmatpush.msrb.mxu1 %v1356_v12 }
 0x1be   :  { %752 = vmatpush.msrb.mxu0 %v1360_v14  ;;  %772 = vmatpush.msrb.mxu1 %v1362_v15 }
 0x1c0   :  { %753 = vmatpush.msrb.mxu0 %v1364_v16  ;;  %773 = vmatpush.msrb.mxu1 %v1366_v17 }
 0x1c2   :  { %754 = vmatpush.msrb.mxu0 %v1370_v20  ;;  %774 = vmatpush.msrb.mxu1 %v1372_v21 }
 0x1c4   :  { %755 = vmatpush.msrb.mxu0 %v1376_v24  ;;  %775 = vmatpush.msrb.mxu1 %v1378_v25 }
 0x1c6   :  { %756 = vmatpush.msrb.mxu0 %v1387_v29  ;;  %776 = vmatpush.msrb.mxu1 %v1389_v30 }
 0x1c8   :  { %757 = vmatpush.msrb.mxu0 %v1393_v31  ;;  %777 = vmatpush.msrb.mxu1 %v1395_v32 }
 0x236   :  { %v375_v63 = vpop.f32.mrf.mxu0  ;;  %v395_v28 = vpop.f32.mrf.mxu1 }
 0x237   :  { %v398_v58 = vadd.f32 %v375_v63, %v213_v33  ;;  %v399_v38 = vadd.f32 %v395_v28, %v214_v34 }
 0x239   :  { %v1091_v13 = vmul.f32 -1.442695, %v398_v58  ;;  %v1092_v58 = vmul.f32 -1.442695, %v399_v38 }
 0x23b   :  { %1138 = vpow2.f32 %v1091_v13 }
 0x241   :  { %v1139_v19 = vpop.eup %1138 }
 0x242   :  { %v403_v26 = vadd.f32 1.0, %v1139_v19 }
 0x244   :  { %1140 = vrcp.f32 %v403_v26  ;;  %v415_v39 = vand.u32 2147483648, %v403_v26  ;;  %v413_v33 = vand.u32 2147483647, %v403_v26  ;;  %vm409_vm13 = vweird.f32 %v403_v26 }
 0x245   :  { %1142 = vtanh.f32 %v399_v38 }
 0x246   :  { %v416_v35 = vor.u32 1.1754944e-38, %v415_v39  ;;  %vm414_vm15 = vcmp.eq.f32.partialorder %v413_v33, 8.507059e+37  ;;  %1144 = vpow2.f32 %v1092_v58 }
 0x24a   :  { %v1141_v36 = vpop.eup %1140 }
 0x24b   :  { %v405_v18 = vmul.f32 %v1141_v36, %v403_v26  ;;  %vm410_vm12 = vweird.f32 %v1141_v36  ;;  %v1143_v56 = vpop.eup %1142 }
 0x24c   :  { %vm411_vm14 = vmor %vm409_vm13, %vm410_vm12  ;;  %v1145_v34 = vpop.eup %1144 }
 0x24d   :  { %v406_v27 = vsub.f32 1.0, %v405_v18  ;;  %v423_v13 = vadd.f32 1.0, %v1145_v34 }
 0x24f   :  { %v407_v41 = vmul.f32 %v1141_v36, %v406_v27  ;;  %1146 = vrcp.f32 %v423_v13  ;;  %v435_v33 = vand.u32 2147483648, %v423_v13  ;;  %vm429_vm4 = vweird.f32 %v423_v13 }
 0x250   :  { %v433_v38 = vand.u32 2147483647, %v423_v13 }
 0x251   :  { %v408_v8 = vadd.f32 %v1141_v36, %v407_v41 }
 0x252   :  { %vm434_vm6 = vcmp.eq.f32.partialorder %v433_v38, 8.507059e+37 }
 0x253   :  { %v412_v42 = vsel %vm411_vm14, %v1141_v36, %v408_v8 }
 0x254   :  { %v417_v52 = vsel %vm414_vm15, %v416_v35, %v412_v42  ;;  %v436_v35 = vor.u32 1.1754944e-38, %v435_v33 }
 0x255   :  { %v440_v63 = vmul.f32 %v1143_v56, %v417_v52  ;;  %v1147_v19 = vpop.eup %1146  ;;  %v439_v26 = vmul.f32 %v417_v52, %v1614_v37 }
 0x256   :  { %v425_v28 = vmul.f32 %v1147_v19, %v423_v13  ;;  %vm430_vm2 = vweird.f32 %v1147_v19 }
 0x257   :  { %442 = vrot.lane.b32.xlu1 %v440_v63, %s1305_s3  ;;  %vm431_vm5 = vmor %vm429_vm4, %vm430_vm2 }
 0x258   :  { %v426_v18 = vsub.f32 1.0, %v425_v28 }
 0x25a   :  { %v427_v27 = vmul.f32 %v1147_v19, %v426_v18 }
 0x25c   :  { %v428_v36 = vadd.f32 %v1147_v19, %v427_v27 }
 0x25e   :  { %v432_v8 = vsel %vm431_vm5, %v1147_v19, %v428_v36 }
 0x25f   :  { %v437_v56 = vsel %vm434_vm6, %v436_v35, %v432_v8 }
 0x2c9   :  { %v443_v41 = vpop.permute.xlu1 %442 }
 0x2ca   :  { %v1651_v39 = vadd.f32 %v443_v41, %v439_v26 }
 0x2cc   :  { %1148 = vtanh.f32 %v1651_v39 }
 0x2d2   :  { %v1149_v42 = vpop.eup %1148 }
 0x2d3   :  { %v1654_v63 = vmul.f32 %v1149_v42, %v437_v56 }
 0x2d5   :  { %450 = vrot.lane.b32.xlu1 %v1654_v63, %s1305_s3 }
 0x347   :  { %v451_v37 = vpop.permute.xlu1 %450 }
 0x348   :  { %1093 = vmatmul.msk.f32.vlgmr.msrb.gmra.mxu2 %vm80_vm0, %v451_v37  ;;  %1094 = vmatmul.msk.f32.vlgmr.msrb.gmra.mxu3 %vm80_vm0, %v451_v37 }
 0x349   :  { %846 = vmatpush.msrb.mxu2 %v1348_v6  ;;  %866 = vmatpush.msrb.mxu3 %v1350_v7 }
 0x34b   :  { %847 = vmatpush.msrb.mxu2 %v1354_v10  ;;  %867 = vmatpush.msrb.mxu3 %v1356_v12 }
 0x34d   :  { %848 = vmatpush.msrb.mxu2 %v1360_v14  ;;  %868 = vmatpush.msrb.mxu3 %v1362_v15 }
 0x34f   :  { %849 = vmatpush.msrb.mxu2 %v1364_v16  ;;  %869 = vmatpush.msrb.mxu3 %v1366_v17 }
 0x351   :  { %850 = vmatpush.msrb.mxu2 %v1370_v20  ;;  %870 = vmatpush.msrb.mxu3 %v1372_v21 }
 0x353   :  { %851 = vmatpush.msrb.mxu2 %v1376_v24  ;;  %871 = vmatpush.msrb.mxu3 %v1378_v25 }
 0x355   :  { %852 = vmatpush.msrb.mxu2 %v1387_v29  ;;  %872 = vmatpush.msrb.mxu3 %v1389_v30 }
 0x357   :  { %853 = vmatpush.msrb.mxu2 %v1393_v31  ;;  %873 = vmatpush.msrb.mxu3 %v1395_v32 }
 0x3cb   :  { %v471_v52 = vpop.f32.mrf.mxu2  ;;  %v491_v28 = vpop.f32.mrf.mxu3 }
 0x3cc   :  { %v494_v58 = vadd.f32 %v471_v52, %v231_v49  ;;  %v495_v27 = vadd.f32 %v491_v28, %v232_v45 }
 0x3ce   :  { %v1095_v34 = vmul.f32 -1.442695, %v494_v58  ;;  %v1096_v52 = vmul.f32 -1.442695, %v495_v27 }
 0x3d0   :  { %1150 = vpow2.f32 %v1095_v34 }
 0x3d6   :  { %v1151_v13 = vpop.eup %1150 }
 0x3d7   :  { %v499_v19 = vadd.f32 1.0, %v1151_v13 }
 0x3d9   :  { %1152 = vrcp.f32 %v499_v19  ;;  %v511_v36 = vand.u32 2147483648, %v499_v19  ;;  %v509_v49 = vand.u32 2147483647, %v499_v19  ;;  %vm505_vm8 = vweird.f32 %v499_v19 }
 0x3da   :  { %1154 = vtanh.f32 %v495_v27 }
 0x3db   :  { %v512_v8 = vor.u32 1.1754944e-38, %v511_v36  ;;  %vm510_vm10 = vcmp.eq.f32.partialorder %v509_v49, 8.507059e+37  ;;  %1156 = vpow2.f32 %v1096_v52 }
 0x3df   :  { %v1153_v18 = vpop.eup %1152 }
 0x3e0   :  { %v501_v26 = vmul.f32 %v1153_v18, %v499_v19  ;;  %vm506_vm7 = vweird.f32 %v1153_v18  ;;  %v1155_v42 = vpop.eup %1154 }
 0x3e1   :  { %vm507_vm9 = vmor %vm505_vm8, %vm506_vm7  ;;  %v1157_v45 = vpop.eup %1156 }
 0x3e2   :  { %v502_v41 = vsub.f32 1.0, %v501_v26  ;;  %v519_v58 = vadd.f32 1.0, %v1157_v45 }
 0x3e4   :  { %v503_v33 = vmul.f32 %v1153_v18, %v502_v41  ;;  %1158 = vrcp.f32 %v519_v58  ;;  %vm525_vm12 = vweird.f32 %v519_v58  ;;  %v529_v27 = vand.u32 2147483647, %v519_v58 }
 0x3e6   :  { %v504_v38 = vadd.f32 %v1153_v18, %v503_v33  ;;  %v531_v33 = vand.u32 2147483648, %v519_v58  ;;  %vm530_vm14 = vcmp.eq.f32.partialorder %v529_v27, 8.507059e+37 }
 0x3e8   :  { %v508_v35 = vsel %vm507_vm9, %v1153_v18, %v504_v38  ;;  %v532_v38 = vor.u32 1.1754944e-38, %v531_v33 }
 0x3e9   :  { %v513_v56 = vsel %vm510_vm10, %v512_v8, %v508_v35 }
 0x3ea   :  { %v536_v37 = vmul.f32 %v1155_v42, %v513_v56  ;;  %v1159_v34 = vpop.eup %1158  ;;  %v535_v19 = vmul.f32 %v513_v56, %v1651_v39  ;;  %v448_v42 = vadd.f32 %v1654_v63, %v1617_v57 }
 0x3eb   :  { %v521_v13 = vmul.f32 %v1159_v34, %v519_v58  ;;  %vm526_vm11 = vweird.f32 %v1159_v34 }
 0x3ec   :  { %538 = vrot.lane.b32.xlu2 %v536_v37, %s1305_s3  ;;  %vm527_vm13 = vmor %vm525_vm12, %vm526_vm11 }
 0x3ed   :  { %v522_v28 = vsub.f32 1.0, %v521_v13 }
 0x3ef   :  { %v523_v26 = vmul.f32 %v1159_v34, %v522_v28 }
 0x3f1   :  { %v524_v18 = vadd.f32 %v1159_v34, %v523_v26 }
 0x3f3   :  { %v528_v49 = vsel %vm527_vm13, %v1159_v34, %v524_v18 }
 0x3f4   :  { %v533_v35 = vsel %vm530_vm14, %v532_v38, %v528_v49 }
 0x446   :  { %v539_v41 = vpop.permute.xlu2 %538 }
 0x447   :  { %v1688_v36 = vadd.f32 %v539_v41, %v535_v19 }
 0x449   :  { %1160 = vtanh.f32 %v1688_v36 }
 0x44f   :  { %v1161_v8 = vpop.eup %1160 }
 0x450   :  { %v543_v39 = vmul.f32 %v1161_v8, %v533_v35 }
 0x452   :  { %546 = vrot.lane.b32.xlu2 %v543_v39, %s1305_s3  ;;  %v1694_v56 = vadd.f32 %v543_v39, %v448_v42 }
 0x4ac   :  { %v547_v37 = vpop.permute.xlu2 %546 }
 0x4ad   :  { %1097 = vmatmul.msk.f32.vlgmr.msra.gmra.mxu0 %vm80_vm0, %v547_v37  ;;  %1098 = vmatmul.msk.f32.vlgmr.msra.gmra.mxu1 %vm80_vm0, %v547_v37 }
 0x4ae   :  { %942 = vmatpush.msra.mxu0 %v1348_v6  ;;  %962 = vmatpush.msra.mxu1 %v1350_v7 }
 0x4b0   :  { %943 = vmatpush.msra.mxu0 %v1354_v10  ;;  %963 = vmatpush.msra.mxu1 %v1356_v12 }
 0x4b2   :  { %944 = vmatpush.msra.mxu0 %v1360_v14  ;;  %964 = vmatpush.msra.mxu1 %v1362_v15 }
 0x4b4   :  { %945 = vmatpush.msra.mxu0 %v1364_v16  ;;  %965 = vmatpush.msra.mxu1 %v1366_v17 }
 0x4b6   :  { %946 = vmatpush.msra.mxu0 %v1370_v20  ;;  %966 = vmatpush.msra.mxu1 %v1372_v21 }
 0x4b8   :  { %947 = vmatpush.msra.mxu0 %v1376_v24  ;;  %967 = vmatpush.msra.mxu1 %v1378_v25 }
 0x4ba   :  { %948 = vmatpush.msra.mxu0 %v1387_v29  ;;  %968 = vmatpush.msra.mxu1 %v1389_v30 }
 0x4bc   :  { %949 = vmatpush.msra.mxu0 %v1393_v31  ;;  %969 = vmatpush.msra.mxu1 %v1395_v32 }
 0x52a   :  { %v567_v6 = vpop.f32.mrf.mxu0  ;;  %v587_v15 = vpop.f32.mrf.mxu1 }
 0x52b   :  { %v590_v7 = vadd.f32 %v567_v6, %v249_v0  ;;  %v591_v17 = vadd.f32 %v587_v15, %v250_v1 }
 0x52d   :  { %v1099_v10 = vmul.f32 -1.442695, %v590_v7  ;;  %v1100_v52 = vmul.f32 -1.442695, %v591_v17 }
 0x52f   :  { %1162 = vpow2.f32 %v1099_v10 }
 0x535   :  { %v1163_v12 = vpop.eup %1162 }
 0x536   :  { %v595_v14 = vadd.f32 1.0, %v1163_v12 }
 0x538   :  { %1164 = vrcp.f32 %v595_v14  ;;  %v607_v24 = vand.u32 2147483648, %v595_v14  ;;  %v605_v29 = vand.u32 2147483647, %v595_v14  ;;  %vm601_vm2 = vweird.f32 %v595_v14 }
 0x539   :  { %1166 = vtanh.f32 %v591_v17 }
 0x53a   :  { %v608_v31 = vor.u32 1.1754944e-38, %v607_v24  ;;  %vm606_vm5 = vcmp.eq.f32.partialorder %v605_v29, 8.507059e+37  ;;  %1168 = vpow2.f32 %v1100_v52 }
 0x53e   :  { %v1165_v16 = vpop.eup %1164 }
 0x53f   :  { %v597_v20 = vmul.f32 %v1165_v16, %v595_v14  ;;  %vm602_vm15 = vweird.f32 %v1165_v16  ;;  %v1167_v0 = vpop.eup %1166 }
 0x540   :  { %vm603_vm4 = vmor %vm601_vm2, %vm602_vm15  ;;  %v1169_v1 = vpop.eup %1168 }
 0x541   :  { %v598_v21 = vsub.f32 1.0, %v597_v20  ;;  %v615_v45 = vadd.f32 1.0, %v1169_v1 }
 0x543   :  { %v599_v25 = vmul.f32 %v1165_v16, %v598_v21  ;;  %1170 = vrcp.f32 %v615_v45  ;;  %v627_v33 = vand.u32 2147483648, %v615_v45  ;;  %vm621_vm7 = vweird.f32 %v615_v45 }
 0x544   :  { %v625_v27 = vand.u32 2147483647, %v615_v45 }
 0x545   :  { %v600_v30 = vadd.f32 %v1165_v16, %v599_v25  ;;  %v628_v38 = vor.u32 1.1754944e-38, %v627_v33 }
 0x546   :  { %vm626_vm9 = vcmp.eq.f32.partialorder %v625_v27, 8.507059e+37 }
 0x547   :  { %v604_v32 = vsel %vm603_vm4, %v1165_v16, %v600_v30 }
 0x548   :  { %v609_v57 = vsel %vm606_vm5, %v608_v31, %v604_v32 }
 0x549   :  { %v632_v63 = vmul.f32 %v1167_v0, %v609_v57  ;;  %v1171_v58 = vpop.eup %1170  ;;  %v631_v26 = vmul.f32 %v609_v57, %v1688_v36 }
 0x54a   :  { %v617_v34 = vmul.f32 %v1171_v58, %v615_v45  ;;  %vm622_vm6 = vweird.f32 %v1171_v58 }
 0x54b   :  { %634 = vrot.lane.b32.xlu0 %v632_v63, %s1305_s3  ;;  %vm623_vm8 = vmor %vm621_vm7, %vm622_vm6 }
 0x54c   :  { %v618_v13 = vsub.f32 1.0, %v617_v34 }
 0x54e   :  { %v619_v28 = vmul.f32 %v1171_v58, %v618_v13 }
 0x550   :  { %v620_v18 = vadd.f32 %v1171_v58, %v619_v28 }
 0x552   :  { %v624_v49 = vsel %vm623_vm8, %v1171_v58, %v620_v18 }
 0x553   :  { %v629_v35 = vsel %vm626_vm9, %v628_v38, %v624_v49 }
 0x5bd   :  { %v635_v19 = vpop.permute.xlu0 %634 }
 0x5be   :  { %v637_v41 = vadd.f32 %v635_v19, %v631_v26 }
 0x5c0   :  { %1172 = vtanh.f32 %v637_v41 }
 0x5c6   :  { %v1173_v8 = vpop.eup %1172 }
 0x5c7   :  { %v639_v42 = vmul.f32 %v1173_v8, %v629_v35 }
 0x5c9   :  { %642 = vrot.lane.b32.xlu1 %v639_v42, %s1305_s3  ;;  %v640_v39 = vadd.f32 %v639_v42, %v1694_v56 }
 0x63b   :  { %v643_v36 = vpop.permute.xlu1 %642 }
 0x63c   :  { %1101 = vmatmul.msk.f32.vlgmr.msra.gmra.mxu2 %vm80_vm0, %v643_v36  ;;  %1102 = vmatmul.msk.f32.vlgmr.msra.gmra.mxu3 %vm80_vm0, %v643_v36 }
 0x6bf   :  { %v663_v37 = vpop.f32.mrf.mxu2  ;;  %v683_v14 = vpop.f32.mrf.mxu3 }
 0x6c0   :  { %v686_v6 = vadd.f32 %v663_v37, %v251_v2  ;;  %v687_v56 = vadd.f32 %v683_v14, %v252_v4 }
 0x6c2   :  { %v1103_v7 = vmul.f32 -1.442695, %v686_v6  ;;  %v1104_v55 = vmul.f32 -1.442695, %v687_v56 }
 0x6c4   :  { %1174 = vpow2.f32 %v1103_v7 }
 0x6ca   :  { %v1175_v10 = vpop.eup %1174 }
 0x6cb   :  { %v691_v12 = vadd.f32 1.0, %v1175_v10 }
 0x6cd   :  { %1176 = vrcp.f32 %v691_v12  ;;  %v703_v20 = vand.u32 2147483648, %v691_v12  ;;  %v701_v50 = vand.u32 2147483647, %v691_v12  ;;  %vm697_vm11 = vweird.f32 %v691_v12 }
 0x6ce   :  { %1178 = vtanh.f32 %v687_v56 }
 0x6cf   :  { %v704_v2 = vor.u32 1.1754944e-38, %v703_v20  ;;  %vm702_vm13 = vcmp.eq.f32.partialorder %v701_v50, 8.507059e+37  ;;  %1180 = vpow2.f32 %v1104_v55 }
 0x6d3   :  { %v1177_v15 = vpop.eup %1176 }
 0x6d4   :  { %v693_v16 = vmul.f32 %v1177_v15, %v691_v12  ;;  %vm698_vm10 = vweird.f32 %v1177_v15  ;;  %v1179_v25 = vpop.eup %1178 }
 0x6d5   :  { %vm699_vm12 = vmor %vm697_vm11, %vm698_vm10  ;;  %v1181_v62 = vpop.eup %1180 }
 0x6d6   :  { %v694_v17 = vsub.f32 1.0, %v693_v16  ;;  %v711_v4 = vadd.f32 1.0, %v1181_v62 }
 0x6d8   :  { %v695_v21 = vmul.f32 %v1177_v15, %v694_v17  ;;  %1182 = vrcp.f32 %v711_v4  ;;  %v723_v58 = vand.u32 2147483648, %v711_v4  ;;  %vm717_vm15 = vweird.f32 %v711_v4 }
 0x6d9   :  { %v721_v34 = vand.u32 2147483647, %v711_v4 }
 0x6da   :  { %v696_v54 = vadd.f32 %v1177_v15, %v695_v21  ;;  %v724_v28 = vor.u32 1.1754944e-38, %v723_v58 }
 0x6db   :  { %vm722_vm4 = vcmp.eq.f32.partialorder %v721_v34, 8.507059e+37 }
 0x6dc   :  { %v700_v24 = vsel %vm699_vm12, %v1177_v15, %v696_v54 }
 0x6dd   :  { %v705_v29 = vsel %vm702_vm13, %v704_v2, %v700_v24 }
 0x6de   :  { %v728_v30 = vmul.f32 %v1179_v25, %v705_v29  ;;  %v1183_v31 = vpop.eup %1182  ;;  %v727_v63 = vmul.f32 %v705_v29, %v637_v41 }
 0x6df   :  { %v713_v32 = vmul.f32 %v1183_v31, %v711_v4  ;;  %vm718_vm14 = vweird.f32 %v1183_v31 }
 0x6e0   :  { %730 = vrot.lane.b32.xlu2 %v728_v30, %s1305_s3  ;;  %vm719_vm2 = vmor %vm717_vm15, %vm718_vm14 }
 0x6e1   :  { %v714_v0 = vsub.f32 1.0, %v713_v32 }
 0x6e3   :  { %v715_v57 = vmul.f32 %v1183_v31, %v714_v0 }
 0x6e5   :  { %v716_v45 = vadd.f32 %v1183_v31, %v715_v57 }
 0x6e7   :  { %v720_v13 = vsel %vm719_vm2, %v1183_v31, %v716_v45 }
 0x6e8   :  { %v725_v19 = vsel %vm722_vm4, %v724_v28, %v720_v13  ;;  %v1833_v13 = vsel %vm1482_vm3, %v1518_v23, %v1500_v5 }
 0x73a   :  { %v731_v52 = vpop.permute.xlu2 %730 }
 0x73b   :  { %v733_v1 = vadd.f32 %v731_v52, %v727_v63 }
 0x73d   :  { %1184 = vtanh.f32 %v733_v1 }
 0x743   :  { %v1185_v26 = vpop.eup %1184 }
 0x744   :  { %v735_v18 = vmul.f32 %v1185_v26, %v725_v19 }
 0x746   :  { %738 = vrot.lane.b32.xlu0 %v735_v18, %s1305_s3  ;;  %v736_v33 = vadd.f32 %v735_v18, %v640_v39 }
 0x7b8   :  { %v739_v27 = vpop.permute.xlu0 %738 }
 0x7b9   :  { %1105 = vmatmul.msk.f32.vlgmr.msrb.gmra.mxu0 %vm80_vm0, %v739_v27  ;;  %1106 = vmatmul.msk.f32.vlgmr.msrb.gmra.mxu1 %vm80_vm0, %v739_v27 }
 0x836   :  { %v759_v41 = vpop.f32.mrf.mxu0  ;;  %v779_v42 = vpop.f32.mrf.mxu1 }
 0x837   :  { %v782_v49 = vadd.f32 %v759_v41, %v253_v59  ;;  %v783_v39 = vadd.f32 %v779_v42, %v254_v60 }
 0x839   :  { %v1107_v38 = vmul.f32 -1.442695, %v782_v49  ;;  %v1108_v46 = vmul.f32 -1.442695, %v783_v39 }
 0x83b   :  { %1186 = vpow2.f32 %v1107_v38 }
 0x841   :  { %v1187_v8 = vpop.eup %1186 }
 0x842   :  { %v787_v35 = vadd.f32 1.0, %v1187_v8 }
 0x844   :  { %1188 = vrcp.f32 %v787_v35  ;;  %v799_v7 = vand.u32 2147483648, %v787_v35  ;;  %v797_v43 = vand.u32 2147483647, %v787_v35  ;;  %vm793_vm6 = vweird.f32 %v787_v35 }
 0x845   :  { %1190 = vtanh.f32 %v783_v39 }
 0x846   :  { %v800_v59 = vor.u32 1.1754944e-38, %v799_v7  ;;  %vm798_vm8 = vcmp.eq.f32.partialorder %v797_v43, 8.507059e+37  ;;  %1192 = vpow2.f32 %v1108_v46 }
 0x84a   :  { %v1189_v36 = vpop.eup %1188 }
 0x84b   :  { %v789_v37 = vmul.f32 %v1189_v36, %v787_v35  ;;  %vm794_vm5 = vweird.f32 %v1189_v36  ;;  %v1191_v14 = vpop.eup %1190 }
 0x84c   :  { %vm795_vm7 = vmor %vm793_vm6, %vm794_vm5  ;;  %v1193_v48 = vpop.eup %1192 }
 0x84d   :  { %v790_v6 = vsub.f32 1.0, %v789_v37  ;;  %v807_v60 = vadd.f32 1.0, %v1193_v48 }
 0x84f   :  { %v791_v10 = vmul.f32 %v1189_v36, %v790_v6  ;;  %1194 = vrcp.f32 %v807_v60  ;;  %v819_v25 = vand.u32 2147483648, %v807_v60  ;;  %vm813_vm10 = vweird.f32 %v807_v60 }
 0x850   :  { %v817_v29 = vand.u32 2147483647, %v807_v60 }
 0x851   :  { %v792_v44 = vadd.f32 %v1189_v36, %v791_v10  ;;  %v820_v55 = vor.u32 1.1754944e-38, %v819_v25 }
 0x852   :  { %vm818_vm12 = vcmp.eq.f32.partialorder %v817_v29, 8.507059e+37 }
 0x853   :  { %v796_v12 = vsel %vm795_vm7, %v1189_v36, %v792_v44 }
 0x854   :  { %v801_v15 = vsel %vm798_vm8, %v800_v59, %v796_v12 }
 0x855   :  { %v824_v56 = vmul.f32 %v1191_v14, %v801_v15  ;;  %v1195_v16 = vpop.eup %1194  ;;  %v823_v50 = vmul.f32 %v801_v15, %v733_v1 }
 0x856   :  { %v809_v17 = vmul.f32 %v1195_v16, %v807_v60  ;;  %vm814_vm9 = vweird.f32 %v1195_v16 }
 0x857   :  { %826 = vrot.lane.b32.xlu1 %v824_v56, %s1305_s3  ;;  %vm815_vm11 = vmor %vm813_vm10, %vm814_vm9 }
 0x858   :  { %v810_v20 = vsub.f32 1.0, %v809_v17 }
 0x85a   :  { %v811_v21 = vmul.f32 %v1195_v16, %v810_v20 }
 0x85c   :  { %v812_v24 = vadd.f32 %v1195_v16, %v811_v21 }
 0x85e   :  { %v816_v30 = vsel %vm815_vm11, %v1195_v16, %v812_v24  ;;  %v1834_v16 = vsel %vm1477_vm1, %v1507_v11, %v1504_v9  ;;  %v1835_v24 = vsel %vm1482_vm3, %v1558_v53, %v1531_v40 }
 0x85f   :  { %v821_v4 = vsel %vm818_vm12, %v820_v55, %v816_v30 }
 0x8c9   :  { %v827_v54 = vpop.permute.xlu1 %826 }
 0x8ca   :  { %v829_v2 = vadd.f32 %v827_v54, %v823_v50 }
 0x8cc   :  { %1196 = vtanh.f32 %v829_v2 }
 0x8d2   :  { %v1197_v62 = vpop.eup %1196 }
 0x8d3   :  { %v831_v31 = vmul.f32 %v1197_v62, %v821_v4 }
 0x8d5   :  { %834 = vrot.lane.b32.xlu2 %v831_v31, %s1305_s3  ;;  %v832_v32 = vadd.f32 %v831_v31, %v736_v33 }
 0x92f   :  { %v835_v0 = vpop.permute.xlu2 %834 }
 0x930   :  { %1109 = vmatmul.msk.f32.vlgmr.msrb.gmra.mxu2 %vm80_vm0, %v835_v0  ;;  %1110 = vmatmul.msk.f32.vlgmr.msrb.gmra.mxu3 %vm80_vm0, %v835_v0 }
 0x9b3   :  { %v855_v57 = vpop.f32.mrf.mxu2  ;;  %v875_v58 = vpop.f32.mrf.mxu3 }
 0x9b4   :  { %v878_v63 = vadd.f32 %v855_v57, %v255_v61  ;;  %v879_v28 = vadd.f32 %v875_v58, %v1833_v13  ;;  %v1033_v57 = vld [vmem:[%s1826_s4 + $0x38] sm:$0xff]  ;;  %v1028_v13 = vld [vmem:[%s1826_s4 + $0x10] sm:$0xff] }
 0x9b5   :  { %1051 = vmatpush.msra.mxu2 %v1033_v57 }
 0x9b6   :  { %v1111_v52 = vmul.f32 -1.442695, %v878_v63  ;;  %v1112_v5 = vmul.f32 -1.442695, %v879_v28  ;;  %v1032_v63 = vld [vmem:[%s1826_s4 + $0x30] sm:$0xff] }
 0x9b7   :  { %1052 = vmatpush.msra.mxu2 %v1032_v63 }
 0x9b8   :  { %1198 = vpow2.f32 %v1111_v52  ;;  %v1031_v52 = vld [vmem:[%s1826_s4 + $0x28] sm:$0xff] }
 0x9b9   :  { %1053 = vmatpush.msra.mxu2 %v1031_v52 }
 0x9be   :  { %v1199_v1 = vpop.eup %1198 }
 0x9bf   :  { %v883_v45 = vadd.f32 1.0, %v1199_v1 }
 0x9c1   :  { %1200 = vrcp.f32 %v883_v45  ;;  %v895_v18 = vand.u32 2147483648, %v883_v45  ;;  %v893_v3 = vand.u32 2147483647, %v883_v45  ;;  %vm889_vm14 = vweird.f32 %v883_v45 }
 0x9c2   :  { %1202 = vtanh.f32 %v879_v28 }
 0x9c3   :  { %v896_v61 = vor.u32 1.1754944e-38, %v895_v18  ;;  %vm894_vm2 = vcmp.eq.f32.partialorder %v893_v3, 8.507059e+37  ;;  %1204 = vpow2.f32 %v1112_v5 }
 0x9c7   :  { %v1201_v34 = vpop.eup %1200 }
 0x9c8   :  { %v885_v26 = vmul.f32 %v1201_v34, %v883_v45  ;;  %vm890_vm13 = vweird.f32 %v1201_v34  ;;  %v1203_v41 = vpop.eup %1202  ;;  %v1030_v45 = vld [vmem:[%s1826_s4 + $0x20] sm:$0xff] }
 0x9c9   :  { %vm891_vm15 = vmor %vm889_vm14, %vm890_vm13  ;;  %v1205_v23 = vpop.eup %1204  ;;  %1054 = vmatpush.msra.mxu2 %v1030_v45  ;;  %vm1063_vm14 = vcmask 25600  }
 0x9ca   :  { %v886_v19 = vsub.f32 1.0, %v885_v26  ;;  %v903_v8 = vadd.f32 1.0, %v1205_v23  ;;  %v1027_v26 = vld [vmem:[%s1826_s4 + $0x8] sm:$0xff] }
 0x9cc   :  { %v887_v33 = vmul.f32 %v1201_v34, %v886_v19  ;;  %1206 = vrcp.f32 %v903_v8  ;;  %v915_v43 = vand.u32 2147483648, %v903_v8  ;;  %vm909_vm5 = vweird.f32 %v903_v8  ;;  %v1026_v19 = vld [vmem:[%s1826_s4] sm:$0xff] }
 0x9cd   :  { %v913_v44 = vand.u32 2147483647, %v903_v8 }
 0x9ce   :  { %v888_v22 = vadd.f32 %v1201_v34, %v887_v33  ;;  %v916_v12 = vor.u32 1.1754944e-38, %v915_v43 }
 0x9cf   :  { %vm914_vm7 = vcmp.eq.f32.partialorder %v913_v44, 8.507059e+37 }
 0x9d0   :  { %v892_v27 = vsel %vm891_vm15, %v1201_v34, %v888_v22  ;;  %v1029_v34 = vld [vmem:[%s1826_s4 + $0x18] sm:$0xff] }
 0x9d1   :  { %v897_v49 = vsel %vm894_vm2, %v896_v61, %v892_v27  ;;  %1055 = vmatpush.msra.mxu2 %v1029_v34 }
 0x9d2   :  { %v920_v38 = vmul.f32 %v1203_v41, %v897_v49  ;;  %v1207_v35 = vpop.eup %1206  ;;  %v919_v37 = vmul.f32 %v897_v49, %v829_v2 }
 0x9d3   :  { %v905_v42 = vmul.f32 %v1207_v35, %v903_v8  ;;  %vm910_vm4 = vweird.f32 %v1207_v35  ;;  %1056 = vmatpush.msra.mxu2 %v1028_v13 }
 0x9d4   :  { %922 = vrot.lane.b32.xlu0 %v920_v38, %s1305_s3  ;;  %vm911_vm6 = vmor %vm909_vm5, %vm910_vm4 }
 0x9d5   :  { %v906_v36 = vsub.f32 1.0, %v905_v42  ;;  %1057 = vmatpush.msra.mxu2 %v1027_v26 }
 0x9d7   :  { %v907_v39 = vmul.f32 %v1207_v35, %v906_v36  ;;  %1058 = vmatpush.msra.mxu2 %v1026_v19 }
 0x9d9   :  { %v908_v10 = vadd.f32 %v1207_v35, %v907_v39  ;;  %v1125_v39 = vld [vmem:[%s1827_s5] ss:$0 sm:$0xff] }
 0x9db   :  { %v912_v59 = vsel %vm911_vm6, %v1207_v35, %v908_v10 }
 0x9dc   :  { %v917_v15 = vsel %vm914_vm7, %v916_v12, %v912_v59 }
 0xa46   :  { %v923_v6 = vpop.permute.xlu0 %922 }
 0xa47   :  { %v1769_v7 = vadd.f32 %v923_v6, %v919_v37 }
 0xa49   :  { %1208 = vtanh.f32 %v1769_v7 }
 0xa4f   :  { %v1209_v14 = vpop.eup %1208 }
 0xa50   :  { %v927_v56 = vmul.f32 %v1209_v14, %v917_v15 }
 0xa52   :  { %930 = vrot.lane.b32.xlu1 %v927_v56, %s1305_s3  ;;  %v1773_v46 = vadd.f32 %v927_v56, %v832_v32 }
 0xac4   :  { %v931_v48 = vpop.permute.xlu1 %930 }
 0xac5   :  { %1113 = vmatmul.msk.f32.vlgmr.msra.gmra.mxu0 %vm80_vm0, %v931_v48  ;;  %1114 = vmatmul.msk.f32.vlgmr.msra.gmra.mxu1 %vm80_vm0, %v931_v48 }
 0xb42   :  { %v951_v60 = vpop.f32.mrf.mxu0  ;;  %v971_v54 = vpop.f32.mrf.mxu1 }
 0xb43   :  { %v974_v17 = vadd.f32 %v951_v60, %v1834_v16  ;;  %v975_v25 = vadd.f32 %v971_v54, %v1835_v24 }
 0xb45   :  { %v1115_v20 = vmul.f32 -1.442695, %v974_v17  ;;  %v1116_v40 = vmul.f32 -1.442695, %v975_v25 }
 0xb47   :  { %1210 = vpow2.f32 %v1115_v20 }
 0xb4d   :  { %v1211_v21 = vpop.eup %1210 }
 0xb4e   :  { %v979_v50 = vadd.f32 1.0, %v1211_v21 }
 0xb50   :  { %1212 = vrcp.f32 %v979_v50  ;;  %v991_v47 = vand.u32 2147483648, %v979_v50  ;;  %v989_v9 = vand.u32 2147483647, %v979_v50  ;;  %vm985_vm8 = vweird.f32 %v979_v50 }
 0xb51   :  { %1214 = vtanh.f32 %v975_v25 }
 0xb52   :  { %v992_v62 = vor.u32 1.1754944e-38, %v991_v47  ;;  %vm990_vm10 = vcmp.eq.f32.partialorder %v989_v9, 8.507059e+37  ;;  %1216 = vpow2.f32 %v1116_v40 }
 0xb56   :  { %v1213_v2 = vpop.eup %1212 }
 0xb57   :  { %v981_v29 = vmul.f32 %v1213_v2, %v979_v50  ;;  %vm986_vm1 = vweird.f32 %v1213_v2  ;;  %v1215_v31 = vpop.eup %1214 }
 0xb58   :  { %vm987_vm9 = vmor %vm985_vm8, %vm986_vm1  ;;  %v1217_v53 = vpop.eup %1216 }
 0xb59   :  { %v982_v30 = vsub.f32 1.0, %v981_v29  ;;  %v999_v0 = vadd.f32 1.0, %v1217_v53 }
 0xb5b   :  { %v983_v55 = vmul.f32 %v1213_v2, %v982_v30  ;;  %1218 = vrcp.f32 %v999_v0  ;;  %v1011_v27 = vand.u32 2147483648, %v999_v0  ;;  %vm1005_vm11 = vweird.f32 %v999_v0 }
 0xb5c   :  { %v1009_v41 = vand.u32 2147483647, %v999_v0 }
 0xb5d   :  { %v984_v11 = vadd.f32 %v1213_v2, %v983_v55  ;;  %v1012_v38 = vor.u32 1.1754944e-38, %v1011_v27 }
 0xb5e   :  { %vm1010_vm13 = vcmp.eq.f32.partialorder %v1009_v41, 8.507059e+37 }
 0xb5f   :  { %v988_v4 = vsel %vm987_vm9, %v1213_v2, %v984_v11 }
 0xb60   :  { %v993_v32 = vsel %vm990_vm10, %v992_v62, %v988_v4 }
 0xb61   :  { %v1016_v51 = vmul.f32 %v1215_v31, %v993_v32  ;;  %v1219_v1 = vpop.eup %1218  ;;  %v1015_v33 = vmul.f32 %v993_v32, %v1769_v7 }
 0xb62   :  { %v1001_v58 = vmul.f32 %v1219_v1, %v999_v0  ;;  %vm1006_vm3 = vweird.f32 %v1219_v1 }
 0xb63   :  { %1018 = vrot.lane.b32.xlu2 %v1016_v51, %s1305_s3  ;;  %vm1007_vm12 = vmor %vm1005_vm11, %vm1006_vm3 }
 0xb64   :  { %v1002_v28 = vsub.f32 1.0, %v1001_v58 }
 0xb66   :  { %v1003_v18 = vmul.f32 %v1219_v1, %v1002_v28 }
 0xb68   :  { %v1004_v61 = vadd.f32 %v1219_v1, %v1003_v18 }
 0xb6a   :  { %v1008_v49 = vsel %vm1007_vm12, %v1219_v1, %v1004_v61 }
 0xb6b   :  { %v1013_v23 = vsel %vm1010_vm13, %v1012_v38, %v1008_v49 }
 0xbbd   :  { %v1019_v3 = vpop.permute.xlu2 %1018 }
 0xbbe   :  { %v1021_v22 = vadd.f32 %v1019_v3, %v1015_v33 }
 0xbc0   :  { %1220 = vtanh.f32 %v1021_v22 }
 0xbc6   :  { %v1221_v5 = vpop.eup %1220 }
 0xbc7   :  { %v1023_v8 = vmul.f32 %v1221_v5, %v1013_v23 }
 0xbc9   :  { %v1024_v35 = vadd.f32 %v1023_v8, %v1773_v46 }
 0xbcb   :  { %v1025_v42 = vmul.f32 0.125, %v1024_v35 }
 0xbcd   :  { %1039 = vrot.lane.b32.xlu0 %v1025_v42, %s1305_s3 }
 0xc3f   :  { %v1040_v36 = vpop.permute.xlu0 %1039 }
 0xc40   :  { %1117 = vmatmul.msk.f32.vlgmr.msra.gmra.mxu2 %vm80_vm0, %v1040_v36 }
 0xcc3   :  { %v1060_v37 = vpop.f32.mrf.mxu2 }
 0xcc4   :  { %v1061_v6 = vadd.f32 %v1125_v39, %v1060_v37 }
 0xcc6   :  { %1064 = vst.msk [vmem:[#allocation7] sm:$0x3] %vm1063_vm14, %v1061_v6 }
 0xcc7   :  { %1075 = dma.vmem_to_hbm [thread:$0]  %s1071_s30, 32, %s1073_s1, [#allocation4]  }
 0xcc8   :  { %1298 = dma.done.wait [#allocation4], 32  }
 0xcc9   :  { %1299 = vsyncadd [#allocation4], 4294967264 }
 0xcca   :  { %1080 = vsyncpa [#allocation3], 1 }
 0xccb   :  { %1081 = vsyncpa [#allocation6], 1 }
 0xccc   :  { %1082 = vsyncpa [#allocation4], 1 }

</bundles_post_ra>
